<compile_context>
chip_gen: v7x
topology: tpu7x:2x2x1
jax: 0.10.0
libtpu: 0.0.40
codegen_flags: <defaults>
</compile_context>

<pallas_src>
import jax
import jax.numpy as jnp
from jax import lax
from jax.experimental import pallas as pl
from jax.experimental.pallas import tpu as pltpu


def _round_up(x, m):
    return ((x + m - 1) // m) * m


# --------------------------------------------------------------------------- #
# Fused kernel: chunk-wide input projection (MXU) + serial GRU recurrence.
# --------------------------------------------------------------------------- #
def decoder_gru_kernel(x_ref, wi_ref, bi_ref, wh_ref, bhn_ref, h0_ref,
                       out_ref, gi_ref, h_ref):
    """One (batch_tile, time_chunk) grid step.

    x_ref  : (Tc, Bt, Ep) bf16  embedded (+dropout) inputs, time-major
    wi_ref : (Ep, 3*Hp)   bf16  W_ih^T, gate-padded
    bi_ref : (1, 3*Hp)    f32   b_ih with b_hr/b_hz folded in (n slice: b_in only)
    wh_ref : (Hp, 3*Hp)   bf16  W_hh^T, gate-padded
    bhn_ref: (1, Hp)      f32   b_hn (must stay inside r * (.))
    h0_ref : (Bt, Hp)     f32   initial hidden for this batch tile
    out_ref: (Tc, Bt, Hp) f32   hidden states of this chunk
    gi_ref : VMEM (Tc, Bt, 3*Hp) f32  scratch: chunk-wide input projection
    h_ref  : VMEM (Bt, Hp)       f32  scratch: hidden state carried over chunks
    """
    c = pl.program_id(1)
    Tc, Bt, Ep = x_ref.shape
    Hp = h_ref.shape[-1]

    # (1) Whole-chunk input projection in ONE MXU matmul (off the serial chain).
    x2d = x_ref[...].reshape(Tc * Bt, Ep)                               # bf16
    gi = jnp.dot(x2d, wi_ref[...], preferred_element_type=jnp.float32)  # (Tc*Bt, 3Hp)
    gi_ref[...] = (gi + bi_ref[...]).reshape(Tc, Bt, 3 * Hp)

    # (2) Serial recurrence; h lives in VMEM scratch across time chunks.
    @pl.when(c == 0)
    def _():
        h_ref[...] = h0_ref[...]

    wh = wh_ref[...]                                                    # (Hp, 3Hp) bf16
    bhn = bhn_ref[...]                                                  # (1, Hp)  f32

    # TODO(synk): hold W_hh in MXU weight regs across the chunk via
    # pltpu.matmul_push_rhs / matmul_acc_lhs / matmul_pop.
    def step(t, h):
        gi_t = gi_ref[t]                                                # (Bt, 3Hp) f32
        gh = jnp.dot(h.astype(wh.dtype), wh,
                     preferred_element_type=jnp.float32)                # (Bt, 3Hp)
        r = jax.nn.sigmoid(gi_t[:, :Hp] + gh[:, :Hp])
        z = jax.nn.sigmoid(gi_t[:, Hp:2 * Hp] + gh[:, Hp:2 * Hp])
        n = jnp.tanh(gi_t[:, 2 * Hp:] + r * (gh[:, 2 * Hp:] + bhn))
        h = (1.0 - z) * n + z * h
        out_ref[t] = h.astype(out_ref.dtype)
        return h

    # Bounded unroll keeps live ranges small (no vreg spills at larger Tc).
    h_final = lax.fori_loop(0, Tc, step, h_ref[...], unroll=min(Tc, 8))
    h_ref[...] = h_final


# --------------------------------------------------------------------------- #
# Weight / bias packing (PyTorch gate order r, z, n).
# --------------------------------------------------------------------------- #
def _pack_gate_weights(w, H, Hp, in_dim, in_pad):
    """(3H, in_dim) gate-stacked -> (in_pad, 3*Hp) bf16, transposed, each gate
    at lane offset g*Hp (zero-padded, lane-dense)."""
    cols = []
    for g in range(3):
        blk = jnp.transpose(w[g * H:(g + 1) * H, :])            # (in_dim, H)
        blk = jnp.pad(blk, ((0, in_pad - in_dim), (0, Hp - H)))
        cols.append(blk)
    return jnp.concatenate(cols, axis=1).astype(jnp.bfloat16)


def _pack_biases(b_ih, b_hh, H, Hp):
    """Fold b_hr / b_hz into the input-side bias.  b_hn stays separate because
    it must remain inside r * (W_hn h + b_hn)."""
    def seg(v, g):
        return jnp.pad(v[g * H:(g + 1) * H], (0, Hp - H))
    bi = jnp.concatenate([seg(b_ih, 0) + seg(b_hh, 0),
                          seg(b_ih, 1) + seg(b_hh, 1),
                          seg(b_ih, 2)]).reshape(1, 3 * Hp).astype(jnp.float32)
    bhn = seg(b_hh, 2).reshape(1, Hp).astype(jnp.float32)
    return bi, bhn


# --------------------------------------------------------------------------- #
# Wrapper: mirrors Decoder.forward(target, enc_hidden) -> (out, hid).
# --------------------------------------------------------------------------- #
def decoder_forward(target, enc_hidden, params):
    """target: (B, T) int32, enc_hidden: (1, B, H) f32
    returns out (B, T, H), hid (1, B, H)   [batch_first, like nn.GRU]."""
    B, T = target.shape
    E = params["embed"].shape[1]
    H = enc_hidden.shape[-1]

    Bt = 8 if B <= 8 else 16          # batch tile (sublane / bf16-pack aligned)
    Bp = _round_up(B, Bt)
    Hp = _round_up(H, 128)            # lane-align hidden: each gate = full block
    Ep = _round_up(E, 128)            # lane-dense x operand for the MXU
    G = 3 * Hp

    # Time chunk per grid step (fits v7x's 64 MiB VMEM comfortably even at 256).
    Tc = min(_round_up(T, 8), 256)
    Tp = _round_up(T, Tc)
    n_bt, n_tc = Bp // Bt, Tp // Tc

    # Embedding lookup (plain JAX gather), time-major so every per-step kernel
    # access is contiguous.  Dropout: identity (nn.Dropout eval mode).
    # TODO(synk): training-mode dropout mask (pltpu.prng_*) not applied here.
    emb = jnp.take(params["embed"], target.T, axis=0)               # (T, B, E)
    x = jnp.pad(emb, ((0, Tp - T), (0, Bp - B), (0, Ep - E))).astype(jnp.bfloat16)

    wi = _pack_gate_weights(params["w_ih"], H, Hp, E, Ep)           # (Ep, 3Hp) bf16
    wh = _pack_gate_weights(params["w_hh"], H, Hp, H, Hp)           # (Hp, 3Hp) bf16
    bi, bhn = _pack_biases(params["b_ih"], params["b_hh"], H, Hp)

    h0 = jnp.pad(enc_hidden[0], ((0, Bp - B), (0, Hp - H)))         # (Bp, Hp) f32

    # Per-grid-step VMEM footprint -> explicit scoped limit with headroom.
    step_bytes = (2 * Tc * Bt * Ep * 2        # x chunk, bf16, double-buffered
                  + 2 * Tc * Bt * Hp * 4      # out chunk, f32, double-buffered
                  + Tc * Bt * G * 4           # gi scratch
                  + 2 * (Ep + Hp) * G * 2     # resident weights (bf16)
                  + 4 * Bt * Hp * 4)          # h scratch / h0 / slack
    vmem_limit = int(min(max(4 * step_bytes, 32 << 20), 48 << 20))

    out_tm = pl.pallas_call(
        decoder_gru_kernel,
        out_shape=jax.ShapeDtypeStruct((Tp, Bp, Hp), jnp.float32),
        grid=(n_bt, n_tc),
        in_specs=[
            pl.BlockSpec((Tc, Bt, Ep), lambda b, c: (c, b, 0)),     # x chunk
            pl.BlockSpec((Ep, G), lambda b, c: (0, 0)),             # W_ih^T (resident)
            pl.BlockSpec((1, G), lambda b, c: (0, 0)),              # fused bias
            pl.BlockSpec((Hp, G), lambda b, c: (0, 0)),             # W_hh^T (resident)
            pl.BlockSpec((1, Hp), lambda b, c: (0, 0)),             # b_hn
            pl.BlockSpec((Bt, Hp), lambda b, c: (b, 0)),            # h0 tile
        ],
        out_specs=pl.BlockSpec((Tc, Bt, Hp), lambda b, c: (c, b, 0)),
        scratch_shapes=[
            pltpu.VMEM((Tc, Bt, G), jnp.float32),                   # gi chunk
            pltpu.VMEM((Bt, Hp), jnp.float32),                      # carried h
        ],
        compiler_params=pltpu.CompilerParams(
            dimension_semantics=("parallel", "arbitrary"),          # batch ||, time serial
            vmem_limit_bytes=vmem_limit),
    )(x, wi, bi, wh, bhn, h0)

    out = jnp.transpose(out_tm[:T, :B, :H], (1, 0, 2))              # (B, T, H)
    hid = out_tm[T - 1, :B, :H][None]                               # (1, B, H)
    return out, hid


# --------------------------------------------------------------------------- #
# Params init + pure-JAX reference + self-test
# --------------------------------------------------------------------------- #
def init_params(key, vocab_size, embed_size, hidden_size):
    k = jax.random.split(key, 5)
    bound = 1.0 / jnp.sqrt(hidden_size)
    return {
        "embed": jax.random.normal(k[0], (vocab_size, embed_size), jnp.float32),
        "w_ih": jax.random.uniform(k[1], (3 * hidden_size, embed_size),
                                   jnp.float32, -bound, bound),
        "w_hh": jax.random.uniform(k[2], (3 * hidden_size, hidden_size),
                                   jnp.float32, -bound, bound),
        "b_ih": jax.random.uniform(k[3], (3 * hidden_size,),
                                   jnp.float32, -bound, bound),
        "b_hh": jax.random.uniform(k[4], (3 * hidden_size,),
                                   jnp.float32, -bound, bound),
    }


def gru_reference(emb, enc_hidden, w_ih, w_hh, b_ih, b_hh):
    """Pure-JAX f32 reference with PyTorch nn.GRU semantics (batch_first)."""
    B, T, _ = emb.shape
    H = enc_hidden.shape[-1]
    h = enc_hidden[0]
    outs = []
    for t in range(T):
        x = emb[:, t, :]
        gi = x @ w_ih.T + b_ih
        gh = h @ w_hh.T + b_hh
        r = jax.nn.sigmoid(gi[:, :H] + gh[:, :H])
        z = jax.nn.sigmoid(gi[:, H:2 * H] + gh[:, H:2 * H])
        n = jnp.tanh(gi[:, 2 * H:] + r * gh[:, 2 * H:])
        h = (1.0 - z) * n + z * h
        outs.append(h)
    return jnp.stack(outs, axis=1), h[None]


if __name__ == "__main__":
    B, T = 2, 8
    VOCAB, EMBED, HIDDEN = 64, 32, 32

    key = jax.random.PRNGKey(0)
    k_params, k_tgt, k_hid = jax.random.split(key, 3)

    params = init_params(k_params, VOCAB, EMBED, HIDDEN)
    target = jax.random.randint(k_tgt, (B, T), 0, VOCAB, dtype=jnp.int32)
    enc_hidden = 0.1 * jax.random.normal(k_hid, (1, B, HIDDEN), jnp.float32)

    out, hid = jax.jit(decoder_forward)(target, enc_hidden, params)
    jax.block_until_ready((out, hid))

    assert out.shape == (B, T, HIDDEN)
    assert hid.shape == (1, B, HIDDEN)
    # hid must equal the last valid time-step of out
    assert jnp.allclose(out[:, -1, :], hid[0], atol=1e-5)

    # Pure-JAX f32 reference check (bf16 matmul weights => loose tolerance).
    emb_ref = jnp.take(params["embed"], target, axis=0)
    out_ref, hid_ref = gru_reference(emb_ref, enc_hidden, params["w_ih"],
                                     params["w_hh"], params["b_ih"], params["b_hh"])
    assert jnp.allclose(out, out_ref, atol=3e-2), float(jnp.max(jnp.abs(out - out_ref)))
    assert jnp.allclose(hid, hid_ref, atol=3e-2)
    print("KERNEL_OK")
</pallas_src>

<mosaic_0001>
module attributes {stable_mosaic.version = 11 : i64} {
  func.func @decoder_gru_kernel(%arg0: i32, %arg1: i32, %arg2: memref<8x8x128xbf16, #tpu.memory_space<vmem>>, %arg3: memref<128x384xbf16, #tpu.memory_space<vmem>>, %arg4: memref<1x384xf32, #tpu.memory_space<vmem>>, %arg5: memref<128x384xbf16, #tpu.memory_space<vmem>>, %arg6: memref<1x128xf32, #tpu.memory_space<vmem>>, %arg7: memref<8x128xf32, #tpu.memory_space<vmem>>, %arg8: memref<8x8x128xf32, #tpu.memory_space<vmem>>, %arg9: memref<8x8x384xf32, #tpu.memory_space<vmem>>, %arg10: memref<8x128xf32, #tpu.memory_space<vmem>>) attributes {dimension_semantics = [#tpu.dimension_semantics<parallel>, #tpu.dimension_semantics<arbitrary>], iteration_bounds = array<i64: 1, 1>, scalar_prefetch = 0 : i64, scratch_operands = 2 : i64, tpu.core_type = #tpu.core_type<tc>, window_params = [{transform_indices = @transform_0, window_bounds = array<i64: 8, 8, 128>}, {pipeline_mode = #tpu.pipeline_mode<synchronous>, transform_indices = @transform_1, window_bounds = array<i64: 128, 384>}, {pipeline_mode = #tpu.pipeline_mode<synchronous>, transform_indices = @transform_2, window_bounds = array<i64: 1, 384>}, {pipeline_mode = #tpu.pipeline_mode<synchronous>, transform_indices = @transform_3, window_bounds = array<i64: 128, 384>}, {pipeline_mode = #tpu.pipeline_mode<synchronous>, transform_indices = @transform_4, window_bounds = array<i64: 1, 128>}, {transform_indices = @transform_5, window_bounds = array<i64: 8, 128>}, {transform_indices = @transform_6, window_bounds = array<i64: 8, 8, 128>}]} {
    %c0 = arith.constant 0 : index
    %c0_0 = arith.constant 0 : index
    %c0_1 = arith.constant 0 : index
    %0 = vector.load %arg2[%c0, %c0_0, %c0_1] : memref<8x8x128xbf16, #tpu.memory_space<vmem>>, vector<8x8x128xbf16>
    %1 = vector.shape_cast %0 : vector<8x8x128xbf16> to vector<64x128xbf16>
    %c0_2 = arith.constant 0 : index
    %c0_3 = arith.constant 0 : index
    %2 = vector.load %arg3[%c0_2, %c0_3] : memref<128x384xbf16, #tpu.memory_space<vmem>>, vector<128x384xbf16>
    %cst = arith.constant dense<0.000000e+00> : vector<64x384xf32>
    %3 = tpu.matmul %1, %2, %cst {dimension_numbers = #tpu.dot_dimension_numbers<[1], [0], [0], [1], [0, 0, 1, 1], [], []>} : vector<64x128xbf16>, vector<128x384xbf16>, vector<64x384xf32> -> vector<64x384xf32>
    %c0_4 = arith.constant 0 : index
    %c0_5 = arith.constant 0 : index
    %4 = vector.load %arg4[%c0_4, %c0_5] : memref<1x384xf32, #tpu.memory_space<vmem>>, vector<1x384xf32>
    %5 = vector.broadcast %4 : vector<1x384xf32> to vector<64x384xf32>
    %6 = arith.addf %3, %5 : vector<64x384xf32>
    %7 = vector.shape_cast %6 : vector<64x384xf32> to vector<8x8x384xf32>
    %c0_6 = arith.constant 0 : index
    %c0_7 = arith.constant 0 : index
    %c0_8 = arith.constant 0 : index
    %8 = vector.load %arg9[%c0_6, %c0_7, %c0_8] : memref<8x8x384xf32, #tpu.memory_space<vmem>>, vector<8x8x384xf32>
    tpu.vector_store %arg9[%c0_6, %c0_7, %c0_8], %7 {strides = array<i32>} : memref<8x8x384xf32, #tpu.memory_space<vmem>>, vector<8x8x384xf32>,
    %c0_i32 = arith.constant 0 : i32
    %9 = arith.cmpi eq, %arg1, %c0_i32 : i32
    %10 = arith.extui %9 : i1 to i32
    %c0_i32_9 = arith.constant 0 : i32
    %11 = arith.cmpi ne, %10, %c0_i32_9 : i32
    scf.if %11 {
      %c0_83 = arith.constant 0 : index
      %c0_84 = arith.constant 0 : index
      %312 = vector.load %arg7[%c0_83, %c0_84] : memref<8x128xf32, #tpu.memory_space<vmem>>, vector<8x128xf32>
      %c0_85 = arith.constant 0 : index
      %c0_86 = arith.constant 0 : index
      %313 = vector.load %arg10[%c0_85, %c0_86] : memref<8x128xf32, #tpu.memory_space<vmem>>, vector<8x128xf32>
      tpu.vector_store %arg10[%c0_85, %c0_86], %312 {strides = array<i32>} : memref<8x128xf32, #tpu.memory_space<vmem>>, vector<8x128xf32>,
    } else {
    }
    %c0_10 = arith.constant 0 : index
    %c0_11 = arith.constant 0 : index
    %12 = vector.load %arg5[%c0_10, %c0_11] : memref<128x384xbf16, #tpu.memory_space<vmem>>, vector<128x384xbf16>
    %c0_12 = arith.constant 0 : index
    %c0_13 = arith.constant 0 : index
    %13 = vector.load %arg6[%c0_12, %c0_13] : memref<1x128xf32, #tpu.memory_space<vmem>>, vector<1x128xf32>
    %c0_14 = arith.constant 0 : index
    %c0_15 = arith.constant 0 : index
    %14 = vector.load %arg10[%c0_14, %c0_15] : memref<8x128xf32, #tpu.memory_space<vmem>>, vector<8x128xf32>
    %c0_i32_16 = arith.constant 0 : i32
    %15 = arith.index_cast %c0_i32_16 : i32 to index
    %c0_17 = arith.constant 0 : index
    %c0_18 = arith.constant 0 : index
    %16 = vector.load %arg9[%15, %c0_17, %c0_18] : memref<8x8x384xf32, #tpu.memory_space<vmem>>, vector<1x8x384xf32>
    %17 = vector.shape_cast %16 : vector<1x8x384xf32> to vector<8x384xf32>
    %18 = arith.truncf %14 : vector<8x128xf32> to vector<8x128xbf16>
    %cst_19 = arith.constant dense<0.000000e+00> : vector<8x384xf32>
    %19 = tpu.matmul %18, %12, %cst_19 {dimension_numbers = #tpu.dot_dimension_numbers<[1], [0], [0], [1], [0, 0, 1, 1], [], []>} : vector<8x128xbf16>, vector<128x384xbf16>, vector<8x384xf32> -> vector<8x384xf32>
    %20 = vector.extract_strided_slice %17 {offsets = [0, 0], sizes = [8, 128], strides = [1, 1]} : vector<8x384xf32> to vector<8x128xf32>
    %21 = vector.extract_strided_slice %19 {offsets = [0, 0], sizes = [8, 128], strides = [1, 1]} : vector<8x384xf32> to vector<8x128xf32>
    %22 = arith.addf %20, %21 : vector<8x128xf32>
    %23 = arith.negf %22 : vector<8x128xf32>
    %24 = math.exp %23 : vector<8x128xf32>
    %cst_20 = arith.constant 1.000000e+00 : f32
    %25 = vector.broadcast %cst_20 : f32 to vector<8x128xf32>
    %26 = arith.addf %25, %24 : vector<8x128xf32>
    %27 = arith.divf %25, %26 : vector<8x128xf32>
    %28 = vector.extract_strided_slice %17 {offsets = [0, 128], sizes = [8, 128], strides = [1, 1]} : vector<8x384xf32> to vector<8x128xf32>
    %29 = vector.extract_strided_slice %19 {offsets = [0, 128], sizes = [8, 128], strides = [1, 1]} : vector<8x384xf32> to vector<8x128xf32>
    %30 = arith.addf %28, %29 : vector<8x128xf32>
    %31 = arith.negf %30 : vector<8x128xf32>
    %32 = math.exp %31 : vector<8x128xf32>
    %cst_21 = arith.constant 1.000000e+00 : f32
    %33 = vector.broadcast %cst_21 : f32 to vector<8x128xf32>
    %34 = arith.addf %33, %32 : vector<8x128xf32>
    %35 = arith.divf %33, %34 : vector<8x128xf32>
    %36 = vector.extract_strided_slice %17 {offsets = [0, 256], sizes = [8, 128], strides = [1, 1]} : vector<8x384xf32> to vector<8x128xf32>
    %37 = vector.extract_strided_slice %19 {offsets = [0, 256], sizes = [8, 128], strides = [1, 1]} : vector<8x384xf32> to vector<8x128xf32>
    %38 = vector.broadcast %13 : vector<1x128xf32> to vector<8x128xf32>
    %39 = arith.addf %37, %38 : vector<8x128xf32>
    %40 = arith.mulf %27, %39 : vector<8x128xf32>
    %41 = arith.addf %36, %40 : vector<8x128xf32>
    %42 = math.tanh %41 : vector<8x128xf32>
    %cst_22 = arith.constant 1.000000e+00 : f32
    %43 = vector.broadcast %cst_22 : f32 to vector<8x128xf32>
    %44 = arith.subf %43, %35 : vector<8x128xf32>
    %45 = arith.mulf %44, %42 : vector<8x128xf32>
    %46 = arith.mulf %35, %14 : vector<8x128xf32>
    %47 = arith.addf %45, %46 : vector<8x128xf32>
    %48 = arith.index_cast %c0_i32_16 : i32 to index
    %c0_23 = arith.constant 0 : index
    %c0_24 = arith.constant 0 : index
    %49 = vector.load %arg8[%48, %c0_23, %c0_24] : memref<8x8x128xf32, #tpu.memory_space<vmem>>, vector<1x8x128xf32>
    %50 = vector.shape_cast %49 : vector<1x8x128xf32> to vector<8x128xf32>
    %51 = vector.shape_cast %47 : vector<8x128xf32> to vector<1x8x128xf32>
    tpu.vector_store %arg8[%48, %c0_23, %c0_24], %51 {strides = array<i32>} : memref<8x8x128xf32, #tpu.memory_space<vmem>>, vector<1x8x128xf32>,
    %c1_i32 = arith.constant 1 : i32
    %52 = arith.index_cast %c1_i32 : i32 to index
    %c0_25 = arith.constant 0 : index
    %c0_26 = arith.constant 0 : index
    %53 = vector.load %arg9[%52, %c0_25, %c0_26] : memref<8x8x384xf32, #tpu.memory_space<vmem>>, vector<1x8x384xf32>
    %54 = vector.shape_cast %53 : vector<1x8x384xf32> to vector<8x384xf32>
    %55 = arith.truncf %47 : vector<8x128xf32> to vector<8x128xbf16>
    %cst_27 = arith.constant dense<0.000000e+00> : vector<8x384xf32>
    %56 = tpu.matmul %55, %12, %cst_27 {dimension_numbers = #tpu.dot_dimension_numbers<[1], [0], [0], [1], [0, 0, 1, 1], [], []>} : vector<8x128xbf16>, vector<128x384xbf16>, vector<8x384xf32> -> vector<8x384xf32>
    %57 = vector.extract_strided_slice %54 {offsets = [0, 0], sizes = [8, 128], strides = [1, 1]} : vector<8x384xf32> to vector<8x128xf32>
    %58 = vector.extract_strided_slice %56 {offsets = [0, 0], sizes = [8, 128], strides = [1, 1]} : vector<8x384xf32> to vector<8x128xf32>
    %59 = arith.addf %57, %58 : vector<8x128xf32>
    %60 = arith.negf %59 : vector<8x128xf32>
    %61 = math.exp %60 : vector<8x128xf32>
    %cst_28 = arith.constant 1.000000e+00 : f32
    %62 = vector.broadcast %cst_28 : f32 to vector<8x128xf32>
    %63 = arith.addf %62, %61 : vector<8x128xf32>
    %64 = arith.divf %62, %63 : vector<8x128xf32>
    %65 = vector.extract_strided_slice %54 {offsets = [0, 128], sizes = [8, 128], strides = [1, 1]} : vector<8x384xf32> to vector<8x128xf32>
    %66 = vector.extract_strided_slice %56 {offsets = [0, 128], sizes = [8, 128], strides = [1, 1]} : vector<8x384xf32> to vector<8x128xf32>
    %67 = arith.addf %65, %66 : vector<8x128xf32>
    %68 = arith.negf %67 : vector<8x128xf32>
    %69 = math.exp %68 : vector<8x128xf32>
    %cst_29 = arith.constant 1.000000e+00 : f32
    %70 = vector.broadcast %cst_29 : f32 to vector<8x128xf32>
    %71 = arith.addf %70, %69 : vector<8x128xf32>
    %72 = arith.divf %70, %71 : vector<8x128xf32>
    %73 = vector.extract_strided_slice %54 {offsets = [0, 256], sizes = [8, 128], strides = [1, 1]} : vector<8x384xf32> to vector<8x128xf32>
    %74 = vector.extract_strided_slice %56 {offsets = [0, 256], sizes = [8, 128], strides = [1, 1]} : vector<8x384xf32> to vector<8x128xf32>
    %75 = vector.broadcast %13 : vector<1x128xf32> to vector<8x128xf32>
    %76 = arith.addf %74, %75 : vector<8x128xf32>
    %77 = arith.mulf %64, %76 : vector<8x128xf32>
    %78 = arith.addf %73, %77 : vector<8x128xf32>
    %79 = math.tanh %78 : vector<8x128xf32>
    %cst_30 = arith.constant 1.000000e+00 : f32
    %80 = vector.broadcast %cst_30 : f32 to vector<8x128xf32>
    %81 = arith.subf %80, %72 : vector<8x128xf32>
    %82 = arith.mulf %81, %79 : vector<8x128xf32>
    %83 = arith.mulf %72, %47 : vector<8x128xf32>
    %84 = arith.addf %82, %83 : vector<8x128xf32>
    %85 = arith.index_cast %c1_i32 : i32 to index
    %c0_31 = arith.constant 0 : index
    %c0_32 = arith.constant 0 : index
    %86 = vector.load %arg8[%85, %c0_31, %c0_32] : memref<8x8x128xf32, #tpu.memory_space<vmem>>, vector<1x8x128xf32>
    %87 = vector.shape_cast %86 : vector<1x8x128xf32> to vector<8x128xf32>
    %88 = vector.shape_cast %84 : vector<8x128xf32> to vector<1x8x128xf32>
    tpu.vector_store %arg8[%85, %c0_31, %c0_32], %88 {strides = array<i32>} : memref<8x8x128xf32, #tpu.memory_space<vmem>>, vector<1x8x128xf32>,
    %c2_i32 = arith.constant 2 : i32
    %89 = arith.index_cast %c2_i32 : i32 to index
    %c0_33 = arith.constant 0 : index
    %c0_34 = arith.constant 0 : index
    %90 = vector.load %arg9[%89, %c0_33, %c0_34] : memref<8x8x384xf32, #tpu.memory_space<vmem>>, vector<1x8x384xf32>
    %91 = vector.shape_cast %90 : vector<1x8x384xf32> to vector<8x384xf32>
    %92 = arith.truncf %84 : vector<8x128xf32> to vector<8x128xbf16>
    %cst_35 = arith.constant dense<0.000000e+00> : vector<8x384xf32>
    %93 = tpu.matmul %92, %12, %cst_35 {dimension_numbers = #tpu.dot_dimension_numbers<[1], [0], [0], [1], [0, 0, 1, 1], [], []>} : vector<8x128xbf16>, vector<128x384xbf16>, vector<8x384xf32> -> vector<8x384xf32>
    %94 = vector.extract_strided_slice %91 {offsets = [0, 0], sizes = [8, 128], strides = [1, 1]} : vector<8x384xf32> to vector<8x128xf32>
    %95 = vector.extract_strided_slice %93 {offsets = [0, 0], sizes = [8, 128], strides = [1, 1]} : vector<8x384xf32> to vector<8x128xf32>
    %96 = arith.addf %94, %95 : vector<8x128xf32>
    %97 = arith.negf %96 : vector<8x128xf32>
    %98 = math.exp %97 : vector<8x128xf32>
    %cst_36 = arith.constant 1.000000e+00 : f32
    %99 = vector.broadcast %cst_36 : f32 to vector<8x128xf32>
    %100 = arith.addf %99, %98 : vector<8x128xf32>
    %101 = arith.divf %99, %100 : vector<8x128xf32>
    %102 = vector.extract_strided_slice %91 {offsets = [0, 128], sizes = [8, 128], strides = [1, 1]} : vector<8x384xf32> to vector<8x128xf32>
    %103 = vector.extract_strided_slice %93 {offsets = [0, 128], sizes = [8, 128], strides = [1, 1]} : vector<8x384xf32> to vector<8x128xf32>
    %104 = arith.addf %102, %103 : vector<8x128xf32>
    %105 = arith.negf %104 : vector<8x128xf32>
    %106 = math.exp %105 : vector<8x128xf32>
    %cst_37 = arith.constant 1.000000e+00 : f32
    %107 = vector.broadcast %cst_37 : f32 to vector<8x128xf32>
    %108 = arith.addf %107, %106 : vector<8x128xf32>
    %109 = arith.divf %107, %108 : vector<8x128xf32>
    %110 = vector.extract_strided_slice %91 {offsets = [0, 256], sizes = [8, 128], strides = [1, 1]} : vector<8x384xf32> to vector<8x128xf32>
    %111 = vector.extract_strided_slice %93 {offsets = [0, 256], sizes = [8, 128], strides = [1, 1]} : vector<8x384xf32> to vector<8x128xf32>
    %112 = vector.broadcast %13 : vector<1x128xf32> to vector<8x128xf32>
    %113 = arith.addf %111, %112 : vector<8x128xf32>
    %114 = arith.mulf %101, %113 : vector<8x128xf32>
    %115 = arith.addf %110, %114 : vector<8x128xf32>
    %116 = math.tanh %115 : vector<8x128xf32>
    %cst_38 = arith.constant 1.000000e+00 : f32
    %117 = vector.broadcast %cst_38 : f32 to vector<8x128xf32>
    %118 = arith.subf %117, %109 : vector<8x128xf32>
    %119 = arith.mulf %118, %116 : vector<8x128xf32>
    %120 = arith.mulf %109, %84 : vector<8x128xf32>
    %121 = arith.addf %119, %120 : vector<8x128xf32>
    %122 = arith.index_cast %c2_i32 : i32 to index
    %c0_39 = arith.constant 0 : index
    %c0_40 = arith.constant 0 : index
    %123 = vector.load %arg8[%122, %c0_39, %c0_40] : memref<8x8x128xf32, #tpu.memory_space<vmem>>, vector<1x8x128xf32>
    %124 = vector.shape_cast %123 : vector<1x8x128xf32> to vector<8x128xf32>
    %125 = vector.shape_cast %121 : vector<8x128xf32> to vector<1x8x128xf32>
    tpu.vector_store %arg8[%122, %c0_39, %c0_40], %125 {strides = array<i32>} : memref<8x8x128xf32, #tpu.memory_space<vmem>>, vector<1x8x128xf32>,
    %c3_i32 = arith.constant 3 : i32
    %126 = arith.index_cast %c3_i32 : i32 to index
    %c0_41 = arith.constant 0 : index
    %c0_42 = arith.constant 0 : index
    %127 = vector.load %arg9[%126, %c0_41, %c0_42] : memref<8x8x384xf32, #tpu.memory_space<vmem>>, vector<1x8x384xf32>
    %128 = vector.shape_cast %127 : vector<1x8x384xf32> to vector<8x384xf32>
    %129 = arith.truncf %121 : vector<8x128xf32> to vector<8x128xbf16>
    %cst_43 = arith.constant dense<0.000000e+00> : vector<8x384xf32>
    %130 = tpu.matmul %129, %12, %cst_43 {dimension_numbers = #tpu.dot_dimension_numbers<[1], [0], [0], [1], [0, 0, 1, 1], [], []>} : vector<8x128xbf16>, vector<128x384xbf16>, vector<8x384xf32> -> vector<8x384xf32>
    %131 = vector.extract_strided_slice %128 {offsets = [0, 0], sizes = [8, 128], strides = [1, 1]} : vector<8x384xf32> to vector<8x128xf32>
    %132 = vector.extract_strided_slice %130 {offsets = [0, 0], sizes = [8, 128], strides = [1, 1]} : vector<8x384xf32> to vector<8x128xf32>
    %133 = arith.addf %131, %132 : vector<8x128xf32>
    %134 = arith.negf %133 : vector<8x128xf32>
    %135 = math.exp %134 : vector<8x128xf32>
    %cst_44 = arith.constant 1.000000e+00 : f32
    %136 = vector.broadcast %cst_44 : f32 to vector<8x128xf32>
    %137 = arith.addf %136, %135 : vector<8x128xf32>
    %138 = arith.divf %136, %137 : vector<8x128xf32>
    %139 = vector.extract_strided_slice %128 {offsets = [0, 128], sizes = [8, 128], strides = [1, 1]} : vector<8x384xf32> to vector<8x128xf32>
    %140 = vector.extract_strided_slice %130 {offsets = [0, 128], sizes = [8, 128], strides = [1, 1]} : vector<8x384xf32> to vector<8x128xf32>
    %141 = arith.addf %139, %140 : vector<8x128xf32>
    %142 = arith.negf %141 : vector<8x128xf32>
    %143 = math.exp %142 : vector<8x128xf32>
    %cst_45 = arith.constant 1.000000e+00 : f32
    %144 = vector.broadcast %cst_45 : f32 to vector<8x128xf32>
    %145 = arith.addf %144, %143 : vector<8x128xf32>
    %146 = arith.divf %144, %145 : vector<8x128xf32>
    %147 = vector.extract_strided_slice %128 {offsets = [0, 256], sizes = [8, 128], strides = [1, 1]} : vector<8x384xf32> to vector<8x128xf32>
    %148 = vector.extract_strided_slice %130 {offsets = [0, 256], sizes = [8, 128], strides = [1, 1]} : vector<8x384xf32> to vector<8x128xf32>
    %149 = vector.broadcast %13 : vector<1x128xf32> to vector<8x128xf32>
    %150 = arith.addf %148, %149 : vector<8x128xf32>
    %151 = arith.mulf %138, %150 : vector<8x128xf32>
    %152 = arith.addf %147, %151 : vector<8x128xf32>
    %153 = math.tanh %152 : vector<8x128xf32>
    %cst_46 = arith.constant 1.000000e+00 : f32
    %154 = vector.broadcast %cst_46 : f32 to vector<8x128xf32>
    %155 = arith.subf %154, %146 : vector<8x128xf32>
    %156 = arith.mulf %155, %153 : vector<8x128xf32>
    %157 = arith.mulf %146, %121 : vector<8x128xf32>
    %158 = arith.addf %156, %157 : vector<8x128xf32>
    %159 = arith.index_cast %c3_i32 : i32 to index
    %c0_47 = arith.constant 0 : index
    %c0_48 = arith.constant 0 : index
    %160 = vector.load %arg8[%159, %c0_47, %c0_48] : memref<8x8x128xf32, #tpu.memory_space<vmem>>, vector<1x8x128xf32>
    %161 = vector.shape_cast %160 : vector<1x8x128xf32> to vector<8x128xf32>
    %162 = vector.shape_cast %158 : vector<8x128xf32> to vector<1x8x128xf32>
    tpu.vector_store %arg8[%159, %c0_47, %c0_48], %162 {strides = array<i32>} : memref<8x8x128xf32, #tpu.memory_space<vmem>>, vector<1x8x128xf32>,
    %c4_i32 = arith.constant 4 : i32
    %163 = arith.index_cast %c4_i32 : i32 to index
    %c0_49 = arith.constant 0 : index
    %c0_50 = arith.constant 0 : index
    %164 = vector.load %arg9[%163, %c0_49, %c0_50] : memref<8x8x384xf32, #tpu.memory_space<vmem>>, vector<1x8x384xf32>
    %165 = vector.shape_cast %164 : vector<1x8x384xf32> to vector<8x384xf32>
    %166 = arith.truncf %158 : vector<8x128xf32> to vector<8x128xbf16>
    %cst_51 = arith.constant dense<0.000000e+00> : vector<8x384xf32>
    %167 = tpu.matmul %166, %12, %cst_51 {dimension_numbers = #tpu.dot_dimension_numbers<[1], [0], [0], [1], [0, 0, 1, 1], [], []>} : vector<8x128xbf16>, vector<128x384xbf16>, vector<8x384xf32> -> vector<8x384xf32>
    %168 = vector.extract_strided_slice %165 {offsets = [0, 0], sizes = [8, 128], strides = [1, 1]} : vector<8x384xf32> to vector<8x128xf32>
    %169 = vector.extract_strided_slice %167 {offsets = [0, 0], sizes = [8, 128], strides = [1, 1]} : vector<8x384xf32> to vector<8x128xf32>
    %170 = arith.addf %168, %169 : vector<8x128xf32>
    %171 = arith.negf %170 : vector<8x128xf32>
    %172 = math.exp %171 : vector<8x128xf32>
    %cst_52 = arith.constant 1.000000e+00 : f32
    %173 = vector.broadcast %cst_52 : f32 to vector<8x128xf32>
    %174 = arith.addf %173, %172 : vector<8x128xf32>
    %175 = arith.divf %173, %174 : vector<8x128xf32>
    %176 = vector.extract_strided_slice %165 {offsets = [0, 128], sizes = [8, 128], strides = [1, 1]} : vector<8x384xf32> to vector<8x128xf32>
    %177 = vector.extract_strided_slice %167 {offsets = [0, 128], sizes = [8, 128], strides = [1, 1]} : vector<8x384xf32> to vector<8x128xf32>
    %178 = arith.addf %176, %177 : vector<8x128xf32>
    %179 = arith.negf %178 : vector<8x128xf32>
    %180 = math.exp %179 : vector<8x128xf32>
    %cst_53 = arith.constant 1.000000e+00 : f32
    %181 = vector.broadcast %cst_53 : f32 to vector<8x128xf32>
    %182 = arith.addf %181, %180 : vector<8x128xf32>
    %183 = arith.divf %181, %182 : vector<8x128xf32>
    %184 = vector.extract_strided_slice %165 {offsets = [0, 256], sizes = [8, 128], strides = [1, 1]} : vector<8x384xf32> to vector<8x128xf32>
    %185 = vector.extract_strided_slice %167 {offsets = [0, 256], sizes = [8, 128], strides = [1, 1]} : vector<8x384xf32> to vector<8x128xf32>
    %186 = vector.broadcast %13 : vector<1x128xf32> to vector<8x128xf32>
    %187 = arith.addf %185, %186 : vector<8x128xf32>
    %188 = arith.mulf %175, %187 : vector<8x128xf32>
    %189 = arith.addf %184, %188 : vector<8x128xf32>
    %190 = math.tanh %189 : vector<8x128xf32>
    %cst_54 = arith.constant 1.000000e+00 : f32
    %191 = vector.broadcast %cst_54 : f32 to vector<8x128xf32>
    %192 = arith.subf %191, %183 : vector<8x128xf32>
    %193 = arith.mulf %192, %190 : vector<8x128xf32>
    %194 = arith.mulf %183, %158 : vector<8x128xf32>
    %195 = arith.addf %193, %194 : vector<8x128xf32>
    %196 = arith.index_cast %c4_i32 : i32 to index
    %c0_55 = arith.constant 0 : index
    %c0_56 = arith.constant 0 : index
    %197 = vector.load %arg8[%196, %c0_55, %c0_56] : memref<8x8x128xf32, #tpu.memory_space<vmem>>, vector<1x8x128xf32>
    %198 = vector.shape_cast %197 : vector<1x8x128xf32> to vector<8x128xf32>
    %199 = vector.shape_cast %195 : vector<8x128xf32> to vector<1x8x128xf32>
    tpu.vector_store %arg8[%196, %c0_55, %c0_56], %199 {strides = array<i32>} : memref<8x8x128xf32, #tpu.memory_space<vmem>>, vector<1x8x128xf32>,
    %c5_i32 = arith.constant 5 : i32
    %200 = arith.index_cast %c5_i32 : i32 to index
    %c0_57 = arith.constant 0 : index
    %c0_58 = arith.constant 0 : index
    %201 = vector.load %arg9[%200, %c0_57, %c0_58] : memref<8x8x384xf32, #tpu.memory_space<vmem>>, vector<1x8x384xf32>
    %202 = vector.shape_cast %201 : vector<1x8x384xf32> to vector<8x384xf32>
    %203 = arith.truncf %195 : vector<8x128xf32> to vector<8x128xbf16>
    %cst_59 = arith.constant dense<0.000000e+00> : vector<8x384xf32>
    %204 = tpu.matmul %203, %12, %cst_59 {dimension_numbers = #tpu.dot_dimension_numbers<[1], [0], [0], [1], [0, 0, 1, 1], [], []>} : vector<8x128xbf16>, vector<128x384xbf16>, vector<8x384xf32> -> vector<8x384xf32>
    %205 = vector.extract_strided_slice %202 {offsets = [0, 0], sizes = [8, 128], strides = [1, 1]} : vector<8x384xf32> to vector<8x128xf32>
    %206 = vector.extract_strided_slice %204 {offsets = [0, 0], sizes = [8, 128], strides = [1, 1]} : vector<8x384xf32> to vector<8x128xf32>
    %207 = arith.addf %205, %206 : vector<8x128xf32>
    %208 = arith.negf %207 : vector<8x128xf32>
    %209 = math.exp %208 : vector<8x128xf32>
    %cst_60 = arith.constant 1.000000e+00 : f32
    %210 = vector.broadcast %cst_60 : f32 to vector<8x128xf32>
    %211 = arith.addf %210, %209 : vector<8x128xf32>
    %212 = arith.divf %210, %211 : vector<8x128xf32>
    %213 = vector.extract_strided_slice %202 {offsets = [0, 128], sizes = [8, 128], strides = [1, 1]} : vector<8x384xf32> to vector<8x128xf32>
    %214 = vector.extract_strided_slice %204 {offsets = [0, 128], sizes = [8, 128], strides = [1, 1]} : vector<8x384xf32> to vector<8x128xf32>
    %215 = arith.addf %213, %214 : vector<8x128xf32>
    %216 = arith.negf %215 : vector<8x128xf32>
    %217 = math.exp %216 : vector<8x128xf32>
    %cst_61 = arith.constant 1.000000e+00 : f32
    %218 = vector.broadcast %cst_61 : f32 to vector<8x128xf32>
    %219 = arith.addf %218, %217 : vector<8x128xf32>
    %220 = arith.divf %218, %219 : vector<8x128xf32>
    %221 = vector.extract_strided_slice %202 {offsets = [0, 256], sizes = [8, 128], strides = [1, 1]} : vector<8x384xf32> to vector<8x128xf32>
    %222 = vector.extract_strided_slice %204 {offsets = [0, 256], sizes = [8, 128], strides = [1, 1]} : vector<8x384xf32> to vector<8x128xf32>
    %223 = vector.broadcast %13 : vector<1x128xf32> to vector<8x128xf32>
    %224 = arith.addf %222, %223 : vector<8x128xf32>
    %225 = arith.mulf %212, %224 : vector<8x128xf32>
    %226 = arith.addf %221, %225 : vector<8x128xf32>
    %227 = math.tanh %226 : vector<8x128xf32>
    %cst_62 = arith.constant 1.000000e+00 : f32
    %228 = vector.broadcast %cst_62 : f32 to vector<8x128xf32>
    %229 = arith.subf %228, %220 : vector<8x128xf32>
    %230 = arith.mulf %229, %227 : vector<8x128xf32>
    %231 = arith.mulf %220, %195 : vector<8x128xf32>
    %232 = arith.addf %230, %231 : vector<8x128xf32>
    %233 = arith.index_cast %c5_i32 : i32 to index
    %c0_63 = arith.constant 0 : index
    %c0_64 = arith.constant 0 : index
    %234 = vector.load %arg8[%233, %c0_63, %c0_64] : memref<8x8x128xf32, #tpu.memory_space<vmem>>, vector<1x8x128xf32>
    %235 = vector.shape_cast %234 : vector<1x8x128xf32> to vector<8x128xf32>
    %236 = vector.shape_cast %232 : vector<8x128xf32> to vector<1x8x128xf32>
    tpu.vector_store %arg8[%233, %c0_63, %c0_64], %236 {strides = array<i32>} : memref<8x8x128xf32, #tpu.memory_space<vmem>>, vector<1x8x128xf32>,
    %c6_i32 = arith.constant 6 : i32
    %237 = arith.index_cast %c6_i32 : i32 to index
    %c0_65 = arith.constant 0 : index
    %c0_66 = arith.constant 0 : index
    %238 = vector.load %arg9[%237, %c0_65, %c0_66] : memref<8x8x384xf32, #tpu.memory_space<vmem>>, vector<1x8x384xf32>
    %239 = vector.shape_cast %238 : vector<1x8x384xf32> to vector<8x384xf32>
    %240 = arith.truncf %232 : vector<8x128xf32> to vector<8x128xbf16>
    %cst_67 = arith.constant dense<0.000000e+00> : vector<8x384xf32>
    %241 = tpu.matmul %240, %12, %cst_67 {dimension_numbers = #tpu.dot_dimension_numbers<[1], [0], [0], [1], [0, 0, 1, 1], [], []>} : vector<8x128xbf16>, vector<128x384xbf16>, vector<8x384xf32> -> vector<8x384xf32>
    %242 = vector.extract_strided_slice %239 {offsets = [0, 0], sizes = [8, 128], strides = [1, 1]} : vector<8x384xf32> to vector<8x128xf32>
    %243 = vector.extract_strided_slice %241 {offsets = [0, 0], sizes = [8, 128], strides = [1, 1]} : vector<8x384xf32> to vector<8x128xf32>
    %244 = arith.addf %242, %243 : vector<8x128xf32>
    %245 = arith.negf %244 : vector<8x128xf32>
    %246 = math.exp %245 : vector<8x128xf32>
    %cst_68 = arith.constant 1.000000e+00 : f32
    %247 = vector.broadcast %cst_68 : f32 to vector<8x128xf32>
    %248 = arith.addf %247, %246 : vector<8x128xf32>
    %249 = arith.divf %247, %248 : vector<8x128xf32>
    %250 = vector.extract_strided_slice %239 {offsets = [0, 128], sizes = [8, 128], strides = [1, 1]} : vector<8x384xf32> to vector<8x128xf32>
    %251 = vector.extract_strided_slice %241 {offsets = [0, 128], sizes = [8, 128], strides = [1, 1]} : vector<8x384xf32> to vector<8x128xf32>
    %252 = arith.addf %250, %251 : vector<8x128xf32>
    %253 = arith.negf %252 : vector<8x128xf32>
    %254 = math.exp %253 : vector<8x128xf32>
    %cst_69 = arith.constant 1.000000e+00 : f32
    %255 = vector.broadcast %cst_69 : f32 to vector<8x128xf32>
    %256 = arith.addf %255, %254 : vector<8x128xf32>
    %257 = arith.divf %255, %256 : vector<8x128xf32>
    %258 = vector.extract_strided_slice %239 {offsets = [0, 256], sizes = [8, 128], strides = [1, 1]} : vector<8x384xf32> to vector<8x128xf32>
    %259 = vector.extract_strided_slice %241 {offsets = [0, 256], sizes = [8, 128], strides = [1, 1]} : vector<8x384xf32> to vector<8x128xf32>
    %260 = vector.broadcast %13 : vector<1x128xf32> to vector<8x128xf32>
    %261 = arith.addf %259, %260 : vector<8x128xf32>
    %262 = arith.mulf %249, %261 : vector<8x128xf32>
    %263 = arith.addf %258, %262 : vector<8x128xf32>
    %264 = math.tanh %263 : vector<8x128xf32>
    %cst_70 = arith.constant 1.000000e+00 : f32
    %265 = vector.broadcast %cst_70 : f32 to vector<8x128xf32>
    %266 = arith.subf %265, %257 : vector<8x128xf32>
    %267 = arith.mulf %266, %264 : vector<8x128xf32>
    %268 = arith.mulf %257, %232 : vector<8x128xf32>
    %269 = arith.addf %267, %268 : vector<8x128xf32>
    %270 = arith.index_cast %c6_i32 : i32 to index
    %c0_71 = arith.constant 0 : index
    %c0_72 = arith.constant 0 : index
    %271 = vector.load %arg8[%270, %c0_71, %c0_72] : memref<8x8x128xf32, #tpu.memory_space<vmem>>, vector<1x8x128xf32>
    %272 = vector.shape_cast %271 : vector<1x8x128xf32> to vector<8x128xf32>
    %273 = vector.shape_cast %269 : vector<8x128xf32> to vector<1x8x128xf32>
    tpu.vector_store %arg8[%270, %c0_71, %c0_72], %273 {strides = array<i32>} : memref<8x8x128xf32, #tpu.memory_space<vmem>>, vector<1x8x128xf32>,
    %c7_i32 = arith.constant 7 : i32
    %274 = arith.index_cast %c7_i32 : i32 to index
    %c0_73 = arith.constant 0 : index
    %c0_74 = arith.constant 0 : index
    %275 = vector.load %arg9[%274, %c0_73, %c0_74] : memref<8x8x384xf32, #tpu.memory_space<vmem>>, vector<1x8x384xf32>
    %276 = vector.shape_cast %275 : vector<1x8x384xf32> to vector<8x384xf32>
    %277 = arith.truncf %269 : vector<8x128xf32> to vector<8x128xbf16>
    %cst_75 = arith.constant dense<0.000000e+00> : vector<8x384xf32>
    %278 = tpu.matmul %277, %12, %cst_75 {dimension_numbers = #tpu.dot_dimension_numbers<[1], [0], [0], [1], [0, 0, 1, 1], [], []>} : vector<8x128xbf16>, vector<128x384xbf16>, vector<8x384xf32> -> vector<8x384xf32>
    %279 = vector.extract_strided_slice %276 {offsets = [0, 0], sizes = [8, 128], strides = [1, 1]} : vector<8x384xf32> to vector<8x128xf32>
    %280 = vector.extract_strided_slice %278 {offsets = [0, 0], sizes = [8, 128], strides = [1, 1]} : vector<8x384xf32> to vector<8x128xf32>
    %281 = arith.addf %279, %280 : vector<8x128xf32>
    %282 = arith.negf %281 : vector<8x128xf32>
    %283 = math.exp %282 : vector<8x128xf32>
    %cst_76 = arith.constant 1.000000e+00 : f32
    %284 = vector.broadcast %cst_76 : f32 to vector<8x128xf32>
    %285 = arith.addf %284, %283 : vector<8x128xf32>
    %286 = arith.divf %284, %285 : vector<8x128xf32>
    %287 = vector.extract_strided_slice %276 {offsets = [0, 128], sizes = [8, 128], strides = [1, 1]} : vector<8x384xf32> to vector<8x128xf32>
    %288 = vector.extract_strided_slice %278 {offsets = [0, 128], sizes = [8, 128], strides = [1, 1]} : vector<8x384xf32> to vector<8x128xf32>
    %289 = arith.addf %287, %288 : vector<8x128xf32>
    %290 = arith.negf %289 : vector<8x128xf32>
    %291 = math.exp %290 : vector<8x128xf32>
    %cst_77 = arith.constant 1.000000e+00 : f32
    %292 = vector.broadcast %cst_77 : f32 to vector<8x128xf32>
    %293 = arith.addf %292, %291 : vector<8x128xf32>
    %294 = arith.divf %292, %293 : vector<8x128xf32>
    %295 = vector.extract_strided_slice %276 {offsets = [0, 256], sizes = [8, 128], strides = [1, 1]} : vector<8x384xf32> to vector<8x128xf32>
    %296 = vector.extract_strided_slice %278 {offsets = [0, 256], sizes = [8, 128], strides = [1, 1]} : vector<8x384xf32> to vector<8x128xf32>
    %297 = vector.broadcast %13 : vector<1x128xf32> to vector<8x128xf32>
    %298 = arith.addf %296, %297 : vector<8x128xf32>
    %299 = arith.mulf %286, %298 : vector<8x128xf32>
    %300 = arith.addf %295, %299 : vector<8x128xf32>
    %301 = math.tanh %300 : vector<8x128xf32>
    %cst_78 = arith.constant 1.000000e+00 : f32
    %302 = vector.broadcast %cst_78 : f32 to vector<8x128xf32>
    %303 = arith.subf %302, %294 : vector<8x128xf32>
    %304 = arith.mulf %303, %301 : vector<8x128xf32>
    %305 = arith.mulf %294, %269 : vector<8x128xf32>
    %306 = arith.addf %304, %305 : vector<8x128xf32>
    %307 = arith.index_cast %c7_i32 : i32 to index
    %c0_79 = arith.constant 0 : index
    %c0_80 = arith.constant 0 : index
    %308 = vector.load %arg8[%307, %c0_79, %c0_80] : memref<8x8x128xf32, #tpu.memory_space<vmem>>, vector<1x8x128xf32>
    %309 = vector.shape_cast %308 : vector<1x8x128xf32> to vector<8x128xf32>
    %310 = vector.shape_cast %306 : vector<8x128xf32> to vector<1x8x128xf32>
    tpu.vector_store %arg8[%307, %c0_79, %c0_80], %310 {strides = array<i32>} : memref<8x8x128xf32, #tpu.memory_space<vmem>>, vector<1x8x128xf32>,
    %c8_i32 = arith.constant 8 : i32
    %c0_81 = arith.constant 0 : index
    %c0_82 = arith.constant 0 : index
    %311 = vector.load %arg10[%c0_81, %c0_82] : memref<8x128xf32, #tpu.memory_space<vmem>>, vector<8x128xf32>
    tpu.vector_store %arg10[%c0_81, %c0_82], %306 {strides = array<i32>} : memref<8x128xf32, #tpu.memory_space<vmem>>, vector<8x128xf32>,
    return
  }
  func.func @transform_0(%arg0: i32, %arg1: i32) -> (i32, i32, i32) {
    %c0_i32 = arith.constant 0 : i32
    %c0_i32_0 = arith.constant 0 : i32
    return %arg1, %arg0, %c0_i32 : i32, i32, i32
  }
  func.func @transform_1(%arg0: i32, %arg1: i32) -> (i32, i32) {
    %c0_i32 = arith.constant 0 : i32
    %c0_i32_0 = arith.constant 0 : i32
    %c0_i32_1 = arith.constant 0 : i32
    return %c0_i32, %c0_i32_0 : i32, i32
  }
  func.func @transform_2(%arg0: i32, %arg1: i32) -> (i32, i32) {
    %c0_i32 = arith.constant 0 : i32
    %c0_i32_0 = arith.constant 0 : i32
    %c0_i32_1 = arith.constant 0 : i32
    return %c0_i32, %c0_i32_0 : i32, i32
  }
  func.func @transform_3(%arg0: i32, %arg1: i32) -> (i32, i32) {
    %c0_i32 = arith.constant 0 : i32
    %c0_i32_0 = arith.constant 0 : i32
    %c0_i32_1 = arith.constant 0 : i32
    return %c0_i32, %c0_i32_0 : i32, i32
  }
  func.func @transform_4(%arg0: i32, %arg1: i32) -> (i32, i32) {
    %c0_i32 = arith.constant 0 : i32
    %c0_i32_0 = arith.constant 0 : i32
    %c0_i32_1 = arith.constant 0 : i32
    return %c0_i32, %c0_i32_0 : i32, i32
  }
  func.func @transform_5(%arg0: i32, %arg1: i32) -> (i32, i32) {
    %c0_i32 = arith.constant 0 : i32
    %c0_i32_0 = arith.constant 0 : i32
    return %arg0, %c0_i32 : i32, i32
  }
  func.func @transform_6(%arg0: i32, %arg1: i32) -> (i32, i32, i32) {
    %c0_i32 = arith.constant 0 : i32
    %c0_i32_0 = arith.constant 0 : i32
    return %arg1, %arg0, %c0_i32 : i32, i32, i32
  }
}

</mosaic_0001>

<bundles_post_ra>
// kernel: decoder_forward.1
= control target key start
LH: loop header
LB: loop body
LE: loop exit
PB: predicated region body
PF: predicated region fallthrough
CT: control target
= control target key end

     0   :  { %v2703_v1 = vmov 0   ;;  %v2705_v34 = vmov 0.0   ;;  %vm1971_vm0 = vmmov 0   ;;  %v66_v56 = vlaneseq  ;;  %s2696_s1 = inlined_call_operand.vmem [shape: bf16[128,384], index: 1, kind: input, shape index: {}]   ;;  %s2697_s0 = inlined_call_operand.vmem [shape: bf16[8,8,128], index: 0, kind: input, shape index: {}]   ;;  %s2698_s3 = inlined_call_operand.vmem [shape: bf16[128,384], index: 3, kind: input, shape index: {}]   ;;  %s2699_s5 = inlined_call_operand.vmem [shape: f32[8,128], index: 5, kind: input, shape index: {}]   ;;  %s2700_s2 = inlined_call_operand.vmem [shape: f32[1,384], index: 2, kind: input, shape index: {}]   ;;  %s2701_s4 = inlined_call_operand.vmem [shape: f32[1,128], index: 4, kind: input, shape index: {}]   ;;  %s2702_s6 = inlined_call_operand.vmem [shape: f32[8,8,128], index: 6, kind: output, shape index: {}]  }
   0x1   :  { %v1799_v0 = vld [vmem:[%s2696_s1 + $0x4] ss:$12 sps:$4 sm:$0xff]   ;;  %265 = vmatprep.mubr.bf16.mxu0 %v2703_v1  ;;  %v1801_v2 = vld [vmem:[%s2696_s1] ss:$12 sps:$4 sm:$0xff]   ;;  %v1802_v3 = vld [vmem:[%s2696_s1 + $0x1c] ss:$12 sps:$4 sm:$0xff]  }
   0x2   :  { %233 = vmatprep.subr.bf16.mxu0 %v1799_v0  ;;  %v1804_v4 = vld [vmem:[%s2696_s1 + $0x18] ss:$12 sps:$4 sm:$0xff]   ;;  %v1805_v5 = vld [vmem:[%s2696_s1 + $0x34] ss:$12 sps:$4 sm:$0xff]   ;;  %v1807_v6 = vld [vmem:[%s2696_s1 + $0x30] ss:$12 sps:$4 sm:$0xff]  }
   0x3   :  { %234 = vmatpush1.bf16.msra.mxu0 %v1801_v2  ;;  %v1808_v7 = vld [vmem:[%s2696_s1 + $0x4c] ss:$12 sps:$4 sm:$0xff]   ;;  %v1819_v8 = vld [vmem:[%s2696_s1 + $0x8] ss:$12 sps:$4 sm:$0xff]   ;;  %v1811_v10 = vld [vmem:[%s2696_s1 + $0x64] ss:$12 sps:$4 sm:$0xff]  }
   0x4   :  { %235 = vmatprep.subr.bf16.mxu0 %v1802_v3  ;;  %v1810_v9 = vld [vmem:[%s2696_s1 + $0x48] ss:$12 sps:$4 sm:$0xff]   ;;  %1612 = vmatprep.subr.bf16.mxu1 %v1819_v8  ;;  %v1823_v11 = vld [vmem:[%s2696_s1 + $0x20] ss:$12 sps:$4 sm:$0xff]   ;;  %v1826_v13 = vld [vmem:[%s2696_s1 + $0x38] ss:$12 sps:$4 sm:$0xff]  }
   0x5   :  { %1613 = vmatpush3.bf16.msra.mxu1 %v1819_v8  ;;  %v1825_v12 = vld [vmem:[%s2697_s0] sm:$0xff]   ;;  %v1814_v15 = vld [vmem:[%s2696_s1 + $0x7c] ss:$12 sps:$4 sm:$0xff]   ;;  %v1821_v21 = vld [vmem:[%s2696_s1 + $0xac] ss:$12 sps:$4 sm:$0xff]   ;;  %v67_v57 = vshrl.u32 %v66_v56, 7 }
   0x6   :  { %1614 = vmatprep.subr.bf16.mxu1 %v1823_v11  ;;  %v1813_v14 = vld [vmem:[%s2696_s1 + $0x60] ss:$12 sps:$4 sm:$0xff]   ;;  %1628 = vmatprep.mubr.bf16.mxu1 %v1825_v12  ;;  %v1830_v16 = vld [vmem:[%s2696_s1 + $0x50] ss:$12 sps:$4 sm:$0xff]   ;;  %v1816_v17 = vld [vmem:[%s2696_s1 + $0x78] ss:$12 sps:$4 sm:$0xff]  }
   0x7   :  { %236 = vmatpush1.bf16.msra.mxu0 %v1804_v4  ;;  %v1817_v18 = vld [vmem:[%s2696_s1 + $0x94] ss:$12 sps:$4 sm:$0xff]   ;;  %v1820_v20 = vld [vmem:[%s2696_s1 + $0x90] ss:$12 sps:$4 sm:$0xff]   ;;  %v1844_v25 = vld [vmem:[%s2696_s1 + $0x98] ss:$12 sps:$4 sm:$0xff]  }
   0x8   :  { %237 = vmatprep.subr.bf16.mxu0 %v1805_v5  ;;  %v1835_v19 = vld [vmem:[%s2696_s1 + $0x68] ss:$12 sps:$4 sm:$0xff]   ;;  %v1839_v22 = vld [vmem:[%s2696_s1 + $0x80] ss:$12 sps:$4 sm:$0xff]   ;;  %v2080_v24 = vld [vmem:[%s2698_s3 + $0x4] ss:$12 sps:$4 sm:$0xff]  }
   0x9   :  { %1615 = vmatpush3.bf16.msra.mxu1 %v1823_v11  ;;  %v1824_v23 = vld [vmem:[%s2696_s1 + $0xa8] ss:$12 sps:$4 sm:$0xff]   ;;  %v2088_v26 = vld [vmem:[%s2698_s3] ss:$12 sps:$4 sm:$0xff]   ;;  %v1848_v28 = vld [vmem:[%s2696_s1 + $0xb0] ss:$12 sps:$4 sm:$0xff]  }
   0xa   :  { %1616 = vmatprep.subr.bf16.mxu1 %v1826_v13  ;;  %v2094_v27 = vld [vmem:[%s2698_s3 + $0x1c] ss:$12 sps:$4 sm:$0xff]   ;;  %v2103_v29 = vld [vmem:[%s2698_s3 + $0x18] ss:$12 sps:$4 sm:$0xff]   ;;  %v2110_v30 = vld [vmem:[%s2698_s3 + $0x34] ss:$12 sps:$4 sm:$0xff]  }
   0xb   :  { %238 = vmatpush1.bf16.msra.mxu0 %v1807_v6  ;;  %v1834_v31 = vld [vmem:[%s2697_s0 + $0x8] sm:$0xff]   ;;  %v2119_v32 = vld [vmem:[%s2698_s3 + $0x30] ss:$12 sps:$4 sm:$0xff]   ;;  %v2172_v42 = vld [vmem:[%s2698_s3 + $0x38] ss:$12 sps:$4 sm:$0xff]   ;;  %v68_v58 = vsub.s32 0, %v67_v57 }
   0xc   :  { %239 = vmatprep.subr.bf16.mxu0 %v1808_v7  ;;  %v2125_v33 = vld [vmem:[%s2698_s3 + $0x4c] ss:$12 sps:$4 sm:$0xff]   ;;  %v2131_v35 = vld [vmem:[%s2698_s3 + $0x8] ss:$12 sps:$4 sm:$0xff]   ;;  %v2147_v38 = vld [vmem:[%s2698_s3 + $0x64] ss:$12 sps:$4 sm:$0xff]  }
   0xd   :  { %1617 = vmatpush3.bf16.msra.mxu1 %v1826_v13  ;;  %v2137_v36 = vld [vmem:[%s2698_s3 + $0x48] ss:$12 sps:$4 sm:$0xff]   ;;  %v2153_v39 = vld [vmem:[%s2698_s3 + $0x20] ss:$12 sps:$4 sm:$0xff]   ;;  %v1852_v43 = vld [vmem:[%s2697_s0 + $0x18] sm:$0xff]   ;;  %v72_v60 = vsub.s32 1, %v67_v57 }
   0xe   :  { %1618 = vmatprep.subr.bf16.mxu1 %v1830_v16  ;;  %v1843_v37 = vld [vmem:[%s2697_s0 + $0x10] sm:$0xff]   ;;  %v2160_v40 = vld [vmem:[%s2698_s3 + $0x60] ss:$12 sps:$4 sm:$0xff]   ;;  %v2166_v41 = vld [vmem:[%s2698_s3 + $0x7c] ss:$12 sps:$4 sm:$0xff]   ;;  %v76_v5 = vsub.s32 2, %v67_v57 }
   0xf   :  { %240 = vmatpush1.bf16.msra.mxu0 %v1810_v9  ;;  %v2182_v44 = vld [vmem:[%s2698_s3 + $0x78] ss:$12 sps:$4 sm:$0xff]   ;;  %v2189_v45 = vld [vmem:[%s2698_s3 + $0x94] ss:$12 sps:$4 sm:$0xff]   ;;  %v2195_v46 = vld [vmem:[%s2698_s3 + $0x50] ss:$12 sps:$4 sm:$0xff]  }
  0x10   :  { %241 = vmatprep.subr.bf16.mxu0 %v1811_v10  ;;  %v2204_v47 = vld [vmem:[%s2698_s3 + $0x90] ss:$12 sps:$4 sm:$0xff]   ;;  %v2210_v48 = vld [vmem:[%s2698_s3 + $0xac] ss:$12 sps:$4 sm:$0xff]   ;;  %v2216_v49 = vld [vmem:[%s2698_s3 + $0x68] ss:$12 sps:$4 sm:$0xff]  }
  0x11   :  { %1619 = vmatpush3.bf16.msra.mxu1 %v1830_v16  ;;  %v2223_v50 = vld [vmem:[%s2698_s3 + $0xa8] ss:$12 sps:$4 sm:$0xff]   ;;  %v2229_v51 = vld [vmem:[%s2699_s5] sm:$0xff]  ;;  %v2257_v55 = vld [vmem:[%s2698_s3 + $0xb0] ss:$12 sps:$4 sm:$0xff]  }
  0x12   :  { %1620 = vmatprep.subr.bf16.mxu1 %v1835_v19  ;;  %v2236_v52 = vld [vmem:[%s2698_s3 + $0x80] ss:$12 sps:$4 sm:$0xff]   ;;  %v438_v53 = vpack.c.bf16 %v2229_v51, %v2229_v51  ;;  %v2247_v54 = vld [vmem:[%s2698_s3 + $0x98] ss:$12 sps:$4 sm:$0xff]  }
  0x13   :  { %242 = vmatpush1.bf16.msra.mxu0 %v1813_v14  ;;  %v64_v59 = vld [vmem:[%s2700_s2] sm:$0x7] }
  0x14   :  { %243 = vmatprep.subr.bf16.mxu0 %v1814_v15  ;;  %v69_v62 = vrot.slane %v64_v59, %v68_v58  ;;  %v73_v0 = vrot.slane %v64_v59, %v72_v60  ;;  %v2301_v7 = vrot.slane %v64_v59, %v76_v5 }
  0x15   :  { %1621 = vmatpush3.bf16.msra.mxu1 %v1835_v19 }
  0x16   :  { %1622 = vmatprep.subr.bf16.mxu1 %v1839_v22 }
  0x17   :  { %244 = vmatpush1.bf16.msra.mxu0 %v1816_v17 }
  0x18   :  { %245 = vmatprep.subr.bf16.mxu0 %v1817_v18 }
  0x19   :  { %1623 = vmatpush3.bf16.msra.mxu1 %v1839_v22 }
  0x1a   :  { %1624 = vmatprep.subr.bf16.mxu1 %v1844_v25 }
  0x1b   :  { %246 = vmatpush1.bf16.msra.mxu0 %v1820_v20 }
  0x1c   :  { %247 = vmatprep.subr.bf16.mxu0 %v1821_v21 }
  0x1d   :  { %1625 = vmatpush3.bf16.msra.mxu1 %v1844_v25 }
  0x1e   :  { %1626 = vmatprep.subr.bf16.mxu1 %v1848_v28 }
  0x1f   :  { %248 = vmatpush1.bf16.msra.mxu0 %v1824_v23 }
  0x20   :  { %567 = vmatprep.subr.bf16.mxu0 %v2080_v24 }
  0x21   :  { %1627 = vmatpush3.bf16.msra.mxu1 %v1848_v28 }
  0x22   :  { %266 = vmatmul.mubr.bf16.vlgmr.msra.gmra.mrb[0].mxu0 %v1825_v12  ;;  %1636 = vmatprep.subr.bf16.mxu1 %v2705_v34 }
  0x23   :  { %568 = vmatpush1.bf16.msra.mxu0 %v2088_v26  ;;  %275 = vmatprep.mubr.bf16.mxu0 %v2703_v1 }
  0x24   :  { %569 = vmatprep.subr.bf16.mxu0 %v2094_v27  ;;  %1629 = vmatmul.mubr.bf16.vlgmr.msra.gmra.mrb[0].mxu1 %v1834_v31 }
  0x25   :  { %1637 = vmatpush3.bf16.msra.mxu1 %v2131_v35  ;;  %1632 = vmatprep.mubr.bf16.mxu1 %v1843_v37 }
  0x26   :  { %1638 = vmatprep.subr.bf16.mxu1 %v2705_v34 }
  0x27   :  { %570 = vmatpush1.bf16.msra.mxu0 %v2103_v29 }
  0x28   :  { %571 = vmatprep.subr.bf16.mxu0 %v2110_v30 }
  0x29   :  { %1639 = vmatpush3.bf16.msra.mxu1 %v2153_v39 }
  0x2a   :  { %276 = vmatmul.mubr.bf16.gmra.mrb[4].mxu0 %v1834_v31  ;;  %1640 = vmatprep.subr.bf16.mxu1 %v2705_v34 }
  0x2b   :  { %572 = vmatpush1.bf16.msra.mxu0 %v2119_v32  ;;  %285 = vmatprep.mubr.bf16.mxu0 %v2703_v1 }
  0x2c   :  { %573 = vmatprep.subr.bf16.mxu0 %v2125_v33  ;;  %1633 = vmatmul.mubr.bf16.gmra.mrb[4].mxu1 %v1852_v43 }
  0x2d   :  { %1641 = vmatpush3.bf16.msra.mxu1 %v2172_v42  ;;  %1652 = vmatprep.mubr.msk.bf16.mxu1 %vm1971_vm0, %v2705_v34 }
  0x2e   :  { %1642 = vmatprep.subr.bf16.mxu1 %v2705_v34 }
  0x2f   :  { %574 = vmatpush1.bf16.msra.mxu0 %v2137_v36 }
  0x30   :  { %575 = vmatprep.subr.bf16.mxu0 %v2147_v38 }
  0x31   :  { %1643 = vmatpush3.bf16.msra.mxu1 %v2195_v46 }
  0x32   :  { %286 = vmatmul.mubr.bf16.gmra.mrb[8].mxu0 %v1843_v37  ;;  %1644 = vmatprep.subr.bf16.mxu1 %v2705_v34 }
  0x33   :  { %576 = vmatpush1.bf16.msra.mxu0 %v2160_v40  ;;  %295 = vmatprep.mubr.bf16.mxu0 %v2703_v1 }
  0x34   :  { %577 = vmatprep.subr.bf16.mxu0 %v2166_v41 }
  0x35   :  { %1645 = vmatpush3.bf16.msra.mxu1 %v2216_v49 }
  0x36   :  { %1646 = vmatprep.subr.bf16.mxu1 %v2705_v34 }
  0x37   :  { %578 = vmatpush1.bf16.msra.mxu0 %v2182_v44 }
  0x38   :  { %579 = vmatprep.subr.bf16.mxu0 %v2189_v45 }
  0x39   :  { %1647 = vmatpush3.bf16.msra.mxu1 %v2236_v52 }
  0x3a   :  { %296 = vmatmul.mubr.bf16.gmra.mrb[12].mxu0 %v1852_v43  ;;  %1648 = vmatprep.subr.bf16.mxu1 %v2705_v34 }
  0x3b   :  { %580 = vmatpush1.bf16.msra.mxu0 %v2204_v47  ;;  %599 = vmatprep.mubr.bf16.mxu0 %v2703_v1 }
  0x3c   :  { %581 = vmatprep.subr.bf16.mxu0 %v2210_v48 }
  0x3d   :  { %1649 = vmatpush3.bf16.msra.mxu1 %v2247_v54 }
  0x3e   :  { %1650 = vmatprep.subr.bf16.mxu1 %v2705_v34 }
  0x3f   :  { %582 = vmatpush1.bf16.msra.mxu0 %v2223_v50 }
  0x40   :  { %682 = vmatprep.subr.bf16.mxu0 %v2080_v24 }
  0x41   :  { %1651 = vmatpush3.bf16.msra.mxu1 %v2257_v55 }
  0x42   :  { %600 = vmatmul.mubr.bf16.vlgmr.msra.gmra.mrb[16].mxu0 %v438_v53  ;;  %1656 = vmatprep.subr.bf16.mxu1 %v2705_v34 }
  0x43   :  { %683 = vmatpush1.bf16.msra.mxu0 %v2088_v26  ;;  %714 = vmatprep.mubr.bf16.mxu0 %v2703_v1 }
  0x44   :  { %684 = vmatprep.subr.bf16.mxu0 %v2094_v27  ;;  %1653 = vmatmul.mubr.bf16.vlgmr.msra.gmra.mrb[8].mxu1 %v438_v53 }
  0x45   :  { %1657 = vmatpush3.bf16.msra.mxu1 %v2131_v35  ;;  %1672 = vmatprep.mubr.msk.bf16.mxu1 %vm1971_vm0, %v2705_v34 }
  0x46   :  { %1658 = vmatprep.subr.bf16.mxu1 %v2705_v34 }
  0x47   :  { %685 = vmatpush1.bf16.msra.mxu0 %v2103_v29 }
  0x48   :  { %686 = vmatprep.subr.bf16.mxu0 %v2110_v30 }
  0x49   :  { %1659 = vmatpush3.bf16.msra.mxu1 %v2153_v39 }
  0x4a   :  { %1660 = vmatprep.subr.bf16.mxu1 %v2705_v34 }
  0x4b   :  { %687 = vmatpush1.bf16.msra.mxu0 %v2119_v32 }
  0x4c   :  { %688 = vmatprep.subr.bf16.mxu0 %v2125_v33 }
  0x4d   :  { %1661 = vmatpush3.bf16.msra.mxu1 %v2172_v42 }
  0x4e   :  { %1662 = vmatprep.subr.bf16.mxu1 %v2705_v34 }
  0x4f   :  { %689 = vmatpush1.bf16.msra.mxu0 %v2137_v36 }
  0x50   :  { %690 = vmatprep.subr.bf16.mxu0 %v2147_v38 }
  0x51   :  { %1663 = vmatpush3.bf16.msra.mxu1 %v2195_v46 }
  0x52   :  { %1664 = vmatprep.subr.bf16.mxu1 %v2705_v34 }
  0x53   :  { %691 = vmatpush1.bf16.msra.mxu0 %v2160_v40 }
  0x54   :  { %692 = vmatprep.subr.bf16.mxu0 %v2166_v41 }
  0x55   :  { %1665 = vmatpush3.bf16.msra.mxu1 %v2216_v49 }
  0x56   :  { %1666 = vmatprep.subr.bf16.mxu1 %v2705_v34 }
  0x57   :  { %693 = vmatpush1.bf16.msra.mxu0 %v2182_v44 }
  0x58   :  { %694 = vmatprep.subr.bf16.mxu0 %v2189_v45 }
  0x59   :  { %1667 = vmatpush3.bf16.msra.mxu1 %v2236_v52 }
  0x5a   :  { %1668 = vmatprep.subr.bf16.mxu1 %v2705_v34 }
  0x5b   :  { %695 = vmatpush1.bf16.msra.mxu0 %v2204_v47 }
  0x5c   :  { %696 = vmatprep.subr.bf16.mxu0 %v2210_v48 }
  0x5d   :  { %1669 = vmatpush3.bf16.msra.mxu1 %v2247_v54 }
  0x5e   :  { %1670 = vmatprep.subr.bf16.mxu1 %v2705_v34 }
  0x5f   :  { %697 = vmatpush1.bf16.msra.mxu0 %v2223_v50 }
  0x60   :  { %792 = vmatprep.subr.bf16.mxu0 %v2080_v24 }
  0x61   :  { %1671 = vmatpush3.bf16.msra.mxu1 %v2257_v55 }
  0x62   :  { %1676 = vmatprep.subr.bf16.mxu1 %v2705_v34 }
  0xf5   :  { %v267_v61 = vpop.f32.mrb[0].mxu0 }
  0xf6   :  { %v269_v63 = vpop.f32.mrb[1].mxu0 }
  0xf7   :  { %v271_v2 = vpop.f32.mrb[2].mxu0  ;;  %v1630_v13 = vpop.f32.mrb[0].mxu1 }
  0xf8   :  { %v2297_v3 = vadd.f32 %v271_v2, %v69_v62  ;;  %v273_v4 = vpop.f32.mrb[3].mxu0  ;;  %v2310_v16 = vadd.f32 %v1630_v13, %v2301_v7  ;;  %v340_v17 = vpop.f32.mrb[1].mxu1 }
  0xf9   :  { %v2299_v6 = vadd.f32 %v273_v4, %v73_v0  ;;  %v1631_v19 = vpop.f32.mrb[2].mxu1 }
  0xfa   :  { %v2315_v20 = vadd.f32 %v1631_v19, %v2301_v7  ;;  %v343_v21 = vpop.f32.mrb[3].mxu1 }
  0xfb   :  { %v2318_v22 = vadd.f32 %v343_v21, %v2301_v7 }
  0xfd   :  { %v277_v8 = vpop.f32.mrb[4].mxu0 }
  0xfe   :  { %v2303_v9 = vadd.f32 %v277_v8, %v69_v62  ;;  %v279_v10 = vpop.f32.mrb[5].mxu0 }
  0xff   :  { %v2305_v11 = vadd.f32 %v279_v10, %v73_v0  ;;  %v281_v12 = vpop.f32.mrb[6].mxu0  ;;  %v1634_v43 = vpop.f32.mrb[4].mxu1 }
 0x100   :  { %v2307_v14 = vadd.f32 %v281_v12, %v69_v62  ;;  %v283_v15 = vpop.f32.mrb[7].mxu0  ;;  %v2327_v57 = vadd.f32 %v1634_v43, %v2301_v7  ;;  %v356_v58 = vpop.f32.mrb[5].mxu1  ;;  %v270_v43 = vadd.f32 %v269_v63, %v73_v0 }
 0x101   :  { %v2312_v18 = vadd.f32 %v283_v15, %v73_v0  ;;  %v2332_v60 = vadd.f32 %v356_v58, %v2301_v7  ;;  %v1635_v2 = vpop.f32.mrb[6].mxu1 }
 0x102   :  { %2707 = vst [vmem:[#allocation4_spill] sm:$0xff] %v2327_v57  ;;  %v2335_v4 = vadd.f32 %v1635_v2, %v2301_v7  ;;  %v359_v5 = vpop.f32.mrb[7].mxu1 }
 0x103   :  { %v2338_v8 = vadd.f32 %v359_v5, %v2301_v7 }
 0x104   :  { %2708 = vst [vmem:[#allocation5_spill] sm:$0xff] %v2335_v4 }
 0x105   :  { %v287_v23 = vpop.f32.mrb[8].mxu0 }
 0x106   :  { %v2320_v25 = vadd.f32 %v287_v23, %v69_v62  ;;  %v289_v28 = vpop.f32.mrb[9].mxu0 }
 0x107   :  { %v2322_v31 = vadd.f32 %v289_v28, %v73_v0  ;;  %v291_v37 = vpop.f32.mrb[10].mxu0 }
 0x108   :  { %v2324_v53 = vadd.f32 %v291_v37, %v69_v62  ;;  %v293_v56 = vpop.f32.mrb[11].mxu0  ;;  %v268_v37 = vadd.f32 %v267_v61, %v69_v62  ;;  %v2351_v61 = vld [vmem:[%s2701_s4] ss:$0 sm:$0xff] }
 0x109   :  { %v2329_v59 = vadd.f32 %v293_v56, %v73_v0 }
 0x10d   :  { %v297_v10 = vpop.f32.mrb[12].mxu0 }
 0x10e   :  { %v2340_v12 = vadd.f32 %v297_v10, %v69_v62  ;;  %v299_v13 = vpop.f32.mrb[13].mxu0 }
 0x10f   :  { %v2342_v15 = vadd.f32 %v299_v13, %v73_v0  ;;  %v301_v19 = vpop.f32.mrb[14].mxu0 }
 0x110   :  { %2709 = vst [vmem:[#allocation6_spill] sm:$0xff] %v2340_v12  ;;  %v2344_v21 = vadd.f32 %v301_v19, %v69_v62  ;;  %v303_v23 = vpop.f32.mrb[15].mxu0 }
 0x111   :  { %2710 = vst [vmem:[#allocation7_spill] sm:$0xff] %v2342_v15  ;;  %v2346_v28 = vadd.f32 %v303_v23, %v73_v0 }
 0x112   :  { %2711 = vst [vmem:[#allocation8_spill] sm:$0xff] %v2344_v21 }
 0x115   :  { %v601_v56 = vpop.f32.mrb[16].mxu0 }
 0x116   :  { %v648_v58 = vadd.f32 %v601_v56, %v268_v37  ;;  %v603_v2 = vpop.f32.mrb[17].mxu0 }
 0x117   :  { %v655_v1 = vadd.f32 %v603_v2, %v270_v43  ;;  %v605_v5 = vpop.f32.mrb[18].mxu0  ;;  %v642_v57 = vpop.f32.mrb[8].mxu1 }
 0x118   :  { %v1504_v34 = vmul.f32 -1.442695, %v648_v58  ;;  %v606_v4 = vpop.f32.mrb[19].mxu0  ;;  %v1654_v13 = vpop.f32.mrb[9].mxu1  ;;  %v668_v63 = vadd.f32 %v2351_v61, %v642_v57 }
 0x119   :  { %v1505_v10 = vmul.f32 -1.442695, %v655_v1  ;;  %v645_v15 = vpop.f32.mrb[10].mxu1  ;;  %v341_v1 = vadd.f32 %v340_v17, %v2301_v7  ;;  %v2712_v17 = vmov 0.0  }
 0x11a   :  { %1867 = vpow2.f32 %v1504_v34  ;;  %v1655_v19 = vpop.f32.mrb[11].mxu1 }
 0x11b   :  { %1869 = vpow2.f32 %v1505_v10 }
 0x124   :  { %v1868_v21 = vpop.eup %1867 }
 0x125   :  { %v652_v12 = vadd.f32 1.0, %v1868_v21  ;;  %v1870_v23 = vpop.eup %1869 }
 0x126   :  { %v659_v62 = vadd.f32 1.0, %v1870_v23 }
 0x127   :  { %1871 = vrcp.f32 %v652_v12 }
 0x128   :  { %1873 = vrcp.f32 %v659_v62 }
 0x131   :  { %v1872_v0 = vpop.eup %1871 }
 0x132   :  { %v669_v34 = vmul.f32 %v1872_v0, %v668_v63  ;;  %v1874_v15 = vpop.eup %1873 }
 0x133   :  { %v672_v37 = vsub.f32 1.0, %v1874_v15  ;;  %v674_v43 = vmul.f32 %v1874_v15, %v2229_v51  ;;  %v2713_v51 = vmov 0  }
 0x134   :  { %v670_v4 = vadd.f32 %v669_v34, %v341_v1 }
 0x136   :  { %1875 = vtanh.f32 %v670_v4 }
 0x140   :  { %v1876_v21 = vpop.eup %1875 }
 0x141   :  { %v673_v12 = vmul.f32 %v1876_v21, %v672_v37 }
 0x143   :  { %v2356_v56 = vadd.f32 %v674_v43, %v673_v12 }
 0x145   :  { %676 = vst [vmem:[%s2702_s6] sm:$0xff] %v2356_v56  ;;  %v681_v7 = vpack.c.bf16 %v2356_v56, %v2356_v56 }
 0x147   :  { %715 = vmatmul.mubr.bf16.vlgmr.msra.gmra.mrb[20].mxu0 %v681_v7  ;;  %1673 = vmatmul.mubr.bf16.vlgmr.msra.gmra.mrb[12].mxu1 %v681_v7 }
 0x148   :  { %793 = vmatpush1.bf16.msra.mxu0 %v2088_v26  ;;  %1677 = vmatpush3.bf16.msra.mxu1 %v2131_v35 }
 0x149   :  { %794 = vmatprep.subr.bf16.mxu0 %v2094_v27  ;;  %1678 = vmatprep.subr.bf16.mxu1 %v2712_v17 }
 0x14a   :  { %824 = vmatprep.mubr.bf16.mxu0 %v2713_v51  ;;  %1692 = vmatprep.mubr.msk.bf16.mxu1 %vm1971_vm0, %v2712_v17 }
 0x14c   :  { %795 = vmatpush1.bf16.msra.mxu0 %v2103_v29  ;;  %1679 = vmatpush3.bf16.msra.mxu1 %v2153_v39 }
 0x14d   :  { %796 = vmatprep.subr.bf16.mxu0 %v2110_v30  ;;  %1680 = vmatprep.subr.bf16.mxu1 %v2712_v17 }
 0x150   :  { %797 = vmatpush1.bf16.msra.mxu0 %v2119_v32  ;;  %1681 = vmatpush3.bf16.msra.mxu1 %v2172_v42 }
 0x151   :  { %798 = vmatprep.subr.bf16.mxu0 %v2125_v33  ;;  %1682 = vmatprep.subr.bf16.mxu1 %v2712_v17 }
 0x154   :  { %799 = vmatpush1.bf16.msra.mxu0 %v2137_v36  ;;  %1683 = vmatpush3.bf16.msra.mxu1 %v2195_v46 }
 0x155   :  { %800 = vmatprep.subr.bf16.mxu0 %v2147_v38  ;;  %1684 = vmatprep.subr.bf16.mxu1 %v2712_v17 }
 0x158   :  { %801 = vmatpush1.bf16.msra.mxu0 %v2160_v40  ;;  %1685 = vmatpush3.bf16.msra.mxu1 %v2216_v49 }
 0x159   :  { %802 = vmatprep.subr.bf16.mxu0 %v2166_v41  ;;  %1686 = vmatprep.subr.bf16.mxu1 %v2712_v17 }
 0x15c   :  { %803 = vmatpush1.bf16.msra.mxu0 %v2182_v44  ;;  %1687 = vmatpush3.bf16.msra.mxu1 %v2236_v52 }
 0x15d   :  { %804 = vmatprep.subr.bf16.mxu0 %v2189_v45  ;;  %1688 = vmatprep.subr.bf16.mxu1 %v2712_v17 }
 0x160   :  { %805 = vmatpush1.bf16.msra.mxu0 %v2204_v47  ;;  %1689 = vmatpush3.bf16.msra.mxu1 %v2247_v54 }
 0x161   :  { %806 = vmatprep.subr.bf16.mxu0 %v2210_v48  ;;  %1690 = vmatprep.subr.bf16.mxu1 %v2712_v17 }
 0x164   :  { %807 = vmatpush1.bf16.msra.mxu0 %v2223_v50  ;;  %1691 = vmatpush3.bf16.msra.mxu1 %v2257_v55 }
 0x165   :  { %902 = vmatprep.subr.bf16.mxu0 %v2080_v24  ;;  %1696 = vmatprep.subr.bf16.mxu1 %v2712_v17 }
 0x21a   :  { %v716_v57 = vpop.f32.mrb[20].mxu0  ;;  %v757_v58 = vpop.f32.mrb[12].mxu1 }
 0x21b   :  { %v763_v2 = vadd.f32 %v716_v57, %v2297_v3  ;;  %v718_v5 = vpop.f32.mrb[21].mxu0  ;;  %v1674_v10 = vpop.f32.mrb[13].mxu1  ;;  %v777_v21 = vadd.f32 %v2351_v61, %v757_v58 }
 0x21c   :  { %v770_v13 = vadd.f32 %v718_v5, %v2299_v6  ;;  %v720_v19 = vpop.f32.mrb[22].mxu0  ;;  %v760_v23 = vpop.f32.mrb[14].mxu1 }
 0x21d   :  { %v1507_v62 = vmul.f32 -1.442695, %v763_v2  ;;  %v721_v63 = vpop.f32.mrb[23].mxu0  ;;  %v1675_v0 = vpop.f32.mrb[15].mxu1 }
 0x21e   :  { %v1508_v1 = vmul.f32 -1.442695, %v770_v13 }
 0x21f   :  { %1877 = vpow2.f32 %v1507_v62 }
 0x220   :  { %1879 = vpow2.f32 %v1508_v1 }
 0x229   :  { %v1878_v34 = vpop.eup %1877 }
 0x22a   :  { %v767_v4 = vadd.f32 1.0, %v1878_v34  ;;  %v1880_v15 = vpop.eup %1879 }
 0x22b   :  { %v774_v37 = vadd.f32 1.0, %v1880_v15 }
 0x22c   :  { %1881 = vrcp.f32 %v767_v4 }
 0x22d   :  { %1883 = vrcp.f32 %v774_v37 }
 0x236   :  { %v1882_v3 = vpop.eup %1881 }
 0x237   :  { %v778_v12 = vmul.f32 %v1882_v3, %v777_v21  ;;  %v1884_v43 = vpop.eup %1883 }
 0x238   :  { %v781_v7 = vsub.f32 1.0, %v1884_v43  ;;  %v783_v5 = vmul.f32 %v1884_v43, %v2356_v56 }
 0x239   :  { %v779_v6 = vadd.f32 %v778_v12, %v2318_v22 }
 0x23b   :  { %1885 = vtanh.f32 %v779_v6 }
 0x245   :  { %v1886_v57 = vpop.eup %1885 }
 0x246   :  { %v782_v2 = vmul.f32 %v1886_v57, %v781_v7 }
 0x248   :  { %v2404_v10 = vadd.f32 %v783_v5, %v782_v2 }
 0x24a   :  { %1509 = vst [vmem:[%s2702_s6 + $0x8] sm:$0xff] %v2404_v10  ;;  %v791_v58 = vpack.c.bf16 %v2404_v10, %v2404_v10 }
 0x24c   :  { %825 = vmatmul.mubr.bf16.vlgmr.msra.gmra.mrb[24].mxu0 %v791_v58  ;;  %1693 = vmatmul.mubr.bf16.vlgmr.msra.gmra.mrb[16].mxu1 %v791_v58 }
 0x24d   :  { %903 = vmatpush1.bf16.msra.mxu0 %v2088_v26  ;;  %1697 = vmatpush3.bf16.msra.mxu1 %v2131_v35 }
 0x24e   :  { %904 = vmatprep.subr.bf16.mxu0 %v2094_v27  ;;  %1698 = vmatprep.subr.bf16.mxu1 %v2712_v17 }
 0x24f   :  { %934 = vmatprep.mubr.bf16.mxu0 %v2713_v51  ;;  %1712 = vmatprep.mubr.msk.bf16.mxu1 %vm1971_vm0, %v2712_v17 }
 0x251   :  { %905 = vmatpush1.bf16.msra.mxu0 %v2103_v29  ;;  %1699 = vmatpush3.bf16.msra.mxu1 %v2153_v39 }
 0x252   :  { %906 = vmatprep.subr.bf16.mxu0 %v2110_v30  ;;  %1700 = vmatprep.subr.bf16.mxu1 %v2712_v17 }
 0x255   :  { %907 = vmatpush1.bf16.msra.mxu0 %v2119_v32  ;;  %1701 = vmatpush3.bf16.msra.mxu1 %v2172_v42 }
 0x256   :  { %908 = vmatprep.subr.bf16.mxu0 %v2125_v33  ;;  %1702 = vmatprep.subr.bf16.mxu1 %v2712_v17 }
 0x259   :  { %909 = vmatpush1.bf16.msra.mxu0 %v2137_v36  ;;  %1703 = vmatpush3.bf16.msra.mxu1 %v2195_v46 }
 0x25a   :  { %910 = vmatprep.subr.bf16.mxu0 %v2147_v38  ;;  %1704 = vmatprep.subr.bf16.mxu1 %v2712_v17 }
 0x25d   :  { %911 = vmatpush1.bf16.msra.mxu0 %v2160_v40  ;;  %1705 = vmatpush3.bf16.msra.mxu1 %v2216_v49 }
 0x25e   :  { %912 = vmatprep.subr.bf16.mxu0 %v2166_v41  ;;  %1706 = vmatprep.subr.bf16.mxu1 %v2712_v17 }
 0x261   :  { %913 = vmatpush1.bf16.msra.mxu0 %v2182_v44  ;;  %1707 = vmatpush3.bf16.msra.mxu1 %v2236_v52 }
 0x262   :  { %914 = vmatprep.subr.bf16.mxu0 %v2189_v45  ;;  %1708 = vmatprep.subr.bf16.mxu1 %v2712_v17 }
 0x265   :  { %915 = vmatpush1.bf16.msra.mxu0 %v2204_v47  ;;  %1709 = vmatpush3.bf16.msra.mxu1 %v2247_v54 }
 0x266   :  { %916 = vmatprep.subr.bf16.mxu0 %v2210_v48  ;;  %1710 = vmatprep.subr.bf16.mxu1 %v2712_v17 }
 0x269   :  { %917 = vmatpush1.bf16.msra.mxu0 %v2223_v50  ;;  %1711 = vmatpush3.bf16.msra.mxu1 %v2257_v55 }
 0x26a   :  { %1012 = vmatprep.subr.bf16.mxu0 %v2080_v24  ;;  %1716 = vmatprep.subr.bf16.mxu1 %v2712_v17 }
 0x31f   :  { %v826_v22 = vpop.f32.mrb[24].mxu0  ;;  %v867_v56 = vpop.f32.mrb[16].mxu1 }
 0x320   :  { %v873_v13 = vadd.f32 %v826_v22, %v2303_v9  ;;  %v828_v19 = vpop.f32.mrb[25].mxu0  ;;  %v1694_v23 = vpop.f32.mrb[17].mxu1  ;;  %v887_v6 = vadd.f32 %v2351_v61, %v867_v56 }
 0x321   :  { %v880_v62 = vadd.f32 %v828_v19, %v2305_v11  ;;  %v830_v63 = vpop.f32.mrb[26].mxu0  ;;  %v870_v0 = vpop.f32.mrb[18].mxu1 }
 0x322   :  { %v1510_v1 = vmul.f32 -1.442695, %v873_v13  ;;  %v831_v34 = vpop.f32.mrb[27].mxu0  ;;  %v1695_v4 = vpop.f32.mrb[19].mxu1 }
 0x323   :  { %v1511_v15 = vmul.f32 -1.442695, %v880_v62 }
 0x324   :  { %1887 = vpow2.f32 %v1510_v1 }
 0x325   :  { %1889 = vpow2.f32 %v1511_v15 }
 0x32e   :  { %v1888_v37 = vpop.eup %1887 }
 0x32f   :  { %v877_v21 = vadd.f32 1.0, %v1888_v37  ;;  %v1890_v3 = vpop.eup %1889 }
 0x330   :  { %v884_v12 = vadd.f32 1.0, %v1890_v3 }
 0x331   :  { %1891 = vrcp.f32 %v877_v21 }
 0x332   :  { %1893 = vrcp.f32 %v884_v12 }
 0x33b   :  { %v1892_v9 = vpop.eup %1891 }
 0x33c   :  { %v888_v43 = vmul.f32 %v1892_v9, %v887_v6  ;;  %v1894_v7 = vpop.eup %1893 }
 0x33d   :  { %v891_v57 = vsub.f32 1.0, %v1894_v7  ;;  %v893_v58 = vmul.f32 %v1894_v7, %v2404_v10 }
 0x33e   :  { %v889_v11 = vadd.f32 %v888_v43, %v2310_v16 }
 0x340   :  { %1895 = vtanh.f32 %v889_v11 }
 0x34a   :  { %v1896_v2 = vpop.eup %1895 }
 0x34b   :  { %v892_v5 = vmul.f32 %v1896_v2, %v891_v57 }
 0x34d   :  { %v2452_v22 = vadd.f32 %v893_v58, %v892_v5 }
 0x34f   :  { %1512 = vst [vmem:[%s2702_s6 + $0x10] sm:$0xff] %v2452_v22  ;;  %v901_v56 = vpack.c.bf16 %v2452_v22, %v2452_v22 }
 0x351   :  { %935 = vmatmul.mubr.bf16.vlgmr.msra.gmra.mrb[28].mxu0 %v901_v56  ;;  %1713 = vmatmul.mubr.bf16.vlgmr.msra.gmra.mrb[20].mxu1 %v901_v56 }
 0x352   :  { %1013 = vmatpush1.bf16.msra.mxu0 %v2088_v26  ;;  %1717 = vmatpush3.bf16.msra.mxu1 %v2131_v35 }
 0x353   :  { %1014 = vmatprep.subr.bf16.mxu0 %v2094_v27  ;;  %1718 = vmatprep.subr.bf16.mxu1 %v2712_v17 }
 0x354   :  { %1044 = vmatprep.mubr.bf16.mxu0 %v2713_v51  ;;  %1732 = vmatprep.mubr.msk.bf16.mxu1 %vm1971_vm0, %v2712_v17 }
 0x356   :  { %1015 = vmatpush1.bf16.msra.mxu0 %v2103_v29  ;;  %1719 = vmatpush3.bf16.msra.mxu1 %v2153_v39 }
 0x357   :  { %1016 = vmatprep.subr.bf16.mxu0 %v2110_v30  ;;  %1720 = vmatprep.subr.bf16.mxu1 %v2712_v17 }
 0x35a   :  { %1017 = vmatpush1.bf16.msra.mxu0 %v2119_v32  ;;  %1721 = vmatpush3.bf16.msra.mxu1 %v2172_v42 }
 0x35b   :  { %1018 = vmatprep.subr.bf16.mxu0 %v2125_v33  ;;  %1722 = vmatprep.subr.bf16.mxu1 %v2712_v17 }
 0x35e   :  { %1019 = vmatpush1.bf16.msra.mxu0 %v2137_v36  ;;  %1723 = vmatpush3.bf16.msra.mxu1 %v2195_v46 }
 0x35f   :  { %1020 = vmatprep.subr.bf16.mxu0 %v2147_v38  ;;  %1724 = vmatprep.subr.bf16.mxu1 %v2712_v17 }
 0x362   :  { %1021 = vmatpush1.bf16.msra.mxu0 %v2160_v40  ;;  %1725 = vmatpush3.bf16.msra.mxu1 %v2216_v49 }
 0x363   :  { %1022 = vmatprep.subr.bf16.mxu0 %v2166_v41  ;;  %1726 = vmatprep.subr.bf16.mxu1 %v2712_v17 }
 0x366   :  { %1023 = vmatpush1.bf16.msra.mxu0 %v2182_v44  ;;  %1727 = vmatpush3.bf16.msra.mxu1 %v2236_v52 }
 0x367   :  { %1024 = vmatprep.subr.bf16.mxu0 %v2189_v45  ;;  %1728 = vmatprep.subr.bf16.mxu1 %v2712_v17 }
 0x36a   :  { %1025 = vmatpush1.bf16.msra.mxu0 %v2204_v47  ;;  %1729 = vmatpush3.bf16.msra.mxu1 %v2247_v54 }
 0x36b   :  { %1026 = vmatprep.subr.bf16.mxu0 %v2210_v48  ;;  %1730 = vmatprep.subr.bf16.mxu1 %v2712_v17 }
 0x36e   :  { %1027 = vmatpush1.bf16.msra.mxu0 %v2223_v50  ;;  %1731 = vmatpush3.bf16.msra.mxu1 %v2257_v55 }
 0x36f   :  { %1122 = vmatprep.subr.bf16.mxu0 %v2080_v24  ;;  %1736 = vmatprep.subr.bf16.mxu1 %v2712_v17 }
 0x424   :  { %v936_v16 = vpop.f32.mrb[28].mxu0  ;;  %v977_v10 = vpop.f32.mrb[20].mxu1 }
 0x425   :  { %v983_v13 = vadd.f32 %v936_v16, %v2307_v14  ;;  %v938_v19 = vpop.f32.mrb[29].mxu0  ;;  %v1714_v23 = vpop.f32.mrb[21].mxu1  ;;  %v997_v6 = vadd.f32 %v2351_v61, %v977_v10 }
 0x426   :  { %v990_v62 = vadd.f32 %v938_v19, %v2312_v18  ;;  %v940_v63 = vpop.f32.mrb[30].mxu0  ;;  %v980_v0 = vpop.f32.mrb[22].mxu1 }
 0x427   :  { %v1513_v1 = vmul.f32 -1.442695, %v983_v13  ;;  %v941_v34 = vpop.f32.mrb[31].mxu0  ;;  %v1715_v4 = vpop.f32.mrb[23].mxu1 }
 0x428   :  { %v1514_v15 = vmul.f32 -1.442695, %v990_v62 }
 0x429   :  { %1897 = vpow2.f32 %v1513_v1 }
 0x42a   :  { %1899 = vpow2.f32 %v1514_v15 }
 0x433   :  { %v1898_v37 = vpop.eup %1897 }
 0x434   :  { %v987_v21 = vadd.f32 1.0, %v1898_v37  ;;  %v1900_v3 = vpop.eup %1899 }
 0x435   :  { %v994_v12 = vadd.f32 1.0, %v1900_v3 }
 0x436   :  { %1901 = vrcp.f32 %v987_v21 }
 0x437   :  { %1903 = vrcp.f32 %v994_v12 }
 0x440   :  { %v1902_v14 = vpop.eup %1901 }
 0x441   :  { %v998_v9 = vmul.f32 %v1902_v14, %v997_v6  ;;  %v1904_v43 = vpop.eup %1903 }
 0x442   :  { %v1001_v11 = vsub.f32 1.0, %v1904_v43  ;;  %v1003_v2 = vmul.f32 %v1904_v43, %v2452_v22 }
 0x443   :  { %v999_v18 = vadd.f32 %v998_v9, %v2315_v20 }
 0x445   :  { %1905 = vtanh.f32 %v999_v18 }
 0x44f   :  { %v1906_v7 = vpop.eup %1905 }
 0x450   :  { %v1002_v57 = vmul.f32 %v1906_v7, %v1001_v11 }
 0x452   :  { %v2500_v5 = vadd.f32 %v1003_v2, %v1002_v57 }
 0x454   :  { %1515 = vst [vmem:[%s2702_s6 + $0x18] sm:$0xff] %v2500_v5  ;;  %v1011_v58 = vpack.c.bf16 %v2500_v5, %v2500_v5 }
 0x456   :  { %1045 = vmatmul.mubr.bf16.vlgmr.msra.gmra.mrb[32].mxu0 %v1011_v58  ;;  %1733 = vmatmul.mubr.bf16.vlgmr.msra.gmra.mrb[24].mxu1 %v1011_v58  ;;  %v1950_v58 = vld [vmem:[%s2698_s3 + $0x1c] ss:$12 sps:$4 sm:$0xff]  }
 0x457   :  { %1123 = vmatpush1.bf16.msra.mxu0 %v2088_v26  ;;  %1737 = vmatpush3.bf16.msra.mxu1 %v2131_v35 }
 0x458   :  { %1124 = vmatprep.subr.bf16.mxu0 %v2094_v27  ;;  %1738 = vmatprep.subr.bf16.mxu1 %v2712_v17 }
 0x459   :  { %1154 = vmatprep.mubr.bf16.mxu0 %v2713_v51  ;;  %1752 = vmatprep.mubr.msk.bf16.mxu1 %vm1971_vm0, %v2712_v17 }
 0x45b   :  { %1125 = vmatpush1.bf16.msra.mxu0 %v2103_v29  ;;  %1739 = vmatpush3.bf16.msra.mxu1 %v2153_v39 }
 0x45c   :  { %1126 = vmatprep.subr.bf16.mxu0 %v2110_v30  ;;  %1740 = vmatprep.subr.bf16.mxu1 %v2712_v17 }
 0x45f   :  { %1127 = vmatpush1.bf16.msra.mxu0 %v2119_v32  ;;  %1741 = vmatpush3.bf16.msra.mxu1 %v2172_v42 }
 0x460   :  { %1128 = vmatprep.subr.bf16.mxu0 %v2125_v33  ;;  %1742 = vmatprep.subr.bf16.mxu1 %v2712_v17 }
 0x463   :  { %1129 = vmatpush1.bf16.msra.mxu0 %v2137_v36  ;;  %1743 = vmatpush3.bf16.msra.mxu1 %v2195_v46 }
 0x464   :  { %1130 = vmatprep.subr.bf16.mxu0 %v2147_v38  ;;  %1744 = vmatprep.subr.bf16.mxu1 %v2712_v17 }
 0x467   :  { %1131 = vmatpush1.bf16.msra.mxu0 %v2160_v40  ;;  %1745 = vmatpush3.bf16.msra.mxu1 %v2216_v49 }
 0x468   :  { %1132 = vmatprep.subr.bf16.mxu0 %v2166_v41  ;;  %1746 = vmatprep.subr.bf16.mxu1 %v2712_v17 }
 0x46b   :  { %1133 = vmatpush1.bf16.msra.mxu0 %v2182_v44  ;;  %1747 = vmatpush3.bf16.msra.mxu1 %v2236_v52 }
 0x46c   :  { %1134 = vmatprep.subr.bf16.mxu0 %v2189_v45  ;;  %1748 = vmatprep.subr.bf16.mxu1 %v2712_v17 }
 0x46f   :  { %1135 = vmatpush1.bf16.msra.mxu0 %v2204_v47  ;;  %1749 = vmatpush3.bf16.msra.mxu1 %v2247_v54 }
 0x470   :  { %1136 = vmatprep.subr.bf16.mxu0 %v2210_v48  ;;  %1750 = vmatprep.subr.bf16.mxu1 %v2712_v17 }
 0x473   :  { %1137 = vmatpush1.bf16.msra.mxu0 %v2223_v50  ;;  %1751 = vmatpush3.bf16.msra.mxu1 %v2257_v55 }
 0x474   :  { %1232 = vmatprep.subr.bf16.mxu0 %v2080_v24  ;;  %1756 = vmatprep.subr.bf16.mxu1 %v2712_v17 }
 0x529   :  { %v1046_v20 = vpop.f32.mrb[32].mxu0  ;;  %v1087_v22 = vpop.f32.mrb[24].mxu1 }
 0x52a   :  { %v1093_v56 = vadd.f32 %v1046_v20, %v2320_v25  ;;  %v1048_v16 = vpop.f32.mrb[33].mxu0  ;;  %v1734_v10 = vpop.f32.mrb[25].mxu1  ;;  %v1107_v37 = vadd.f32 %v2351_v61, %v1087_v22  ;;  %v1951_v20 = vld [vmem:[%s2698_s3 + $0x18] ss:$12 sps:$4 sm:$0xff]   ;;  %v1952_v22 = vld [vmem:[%s2698_s3 + $0x20] ss:$12 sps:$4 sm:$0xff]  }
 0x52b   :  { %v1100_v13 = vadd.f32 %v1048_v16, %v2322_v31  ;;  %v1050_v19 = vpop.f32.mrb[34].mxu0  ;;  %v1090_v23 = vpop.f32.mrb[26].mxu1  ;;  %v1955_v16 = vld [vmem:[%s2698_s3 + $0x38] ss:$12 sps:$4 sm:$0xff]  }
 0x52c   :  { %v1516_v62 = vmul.f32 -1.442695, %v1093_v56  ;;  %v1051_v63 = vpop.f32.mrb[35].mxu0  ;;  %v1735_v0 = vpop.f32.mrb[27].mxu1  ;;  %v1953_v56 = vld [vmem:[%s2698_s3 + $0x34] ss:$12 sps:$4 sm:$0xff]  }
 0x52d   :  { %v1517_v1 = vmul.f32 -1.442695, %v1100_v13  ;;  %v1956_v10 = vld [vmem:[%s2698_s3 + $0x4c] ss:$12 sps:$4 sm:$0xff]   ;;  %v1957_v13 = vld [vmem:[%s2698_s3 + $0x48] ss:$12 sps:$4 sm:$0xff]  }
 0x52e   :  { %1907 = vpow2.f32 %v1516_v62  ;;  %v1958_v19 = vld [vmem:[%s2698_s3 + $0x50] ss:$12 sps:$4 sm:$0xff]   ;;  %v1960_v62 = vld [vmem:[%s2698_s3 + $0x60] ss:$12 sps:$4 sm:$0xff]   ;;  %v1961_v63 = vld [vmem:[%s2698_s3 + $0x68] ss:$12 sps:$4 sm:$0xff]  }
 0x52f   :  { %1909 = vpow2.f32 %v1517_v1  ;;  %v1959_v23 = vld [vmem:[%s2698_s3 + $0x64] ss:$12 sps:$4 sm:$0xff]   ;;  %v1962_v0 = vld [vmem:[%s2698_s3 + $0x7c] ss:$12 sps:$4 sm:$0xff]  }
 0x530   :  { %v1963_v1 = vld [vmem:[%s2698_s3 + $0x78] ss:$12 sps:$4 sm:$0xff]  }
 0x538   :  { %v1908_v34 = vpop.eup %1907 }
 0x539   :  { %v1097_v24 = vadd.f32 1.0, %v1908_v34  ;;  %v1910_v4 = vpop.eup %1909  ;;  %v1964_v34 = vld [vmem:[%s2698_s3 + $0x80] ss:$12 sps:$4 sm:$0xff]  }
 0x53a   :  { %v1104_v15 = vadd.f32 1.0, %v1910_v4  ;;  %v1966_v4 = vld [vmem:[%s2698_s3 + $0x90] ss:$12 sps:$4 sm:$0xff]  }
 0x53b   :  { %1911 = vrcp.f32 %v1097_v24  ;;  %v1965_v24 = vld [vmem:[%s2698_s3 + $0x94] ss:$12 sps:$4 sm:$0xff]  }
 0x53c   :  { %1913 = vrcp.f32 %v1104_v15  ;;  %v1967_v15 = vld [vmem:[%s2698_s3 + $0xac] ss:$12 sps:$4 sm:$0xff]  }
 0x545   :  { %v1912_v25 = vpop.eup %1911 }
 0x546   :  { %v1108_v21 = vmul.f32 %v1912_v25, %v1107_v37  ;;  %v1914_v3 = vpop.eup %1913  ;;  %v1968_v37 = vld [vmem:[%s2698_s3 + $0xa8] ss:$12 sps:$4 sm:$0xff]  }
 0x547   :  { %v1111_v12 = vsub.f32 1.0, %v1914_v3  ;;  %v1113_v9 = vmul.f32 %v1914_v3, %v2500_v5  ;;  %v1949_v5 = vld [vmem:[%s2698_s3 + $0x8] ss:$12 sps:$4 sm:$0xff]  }
 0x548   :  { %v1109_v31 = vadd.f32 %v1108_v21, %v2332_v60 }
 0x54a   :  { %1915 = vtanh.f32 %v1109_v31  ;;  %v2714_v31 = vld [vmem:[#allocation6_spill] sm:$0xff] }
 0x554   :  { %v1916_v6 = vpop.eup %1915 }
 0x555   :  { %v1112_v14 = vmul.f32 %v1916_v6, %v1111_v12  ;;  %v2715_v6 = vld [vmem:[#allocation7_spill] sm:$0xff] }
 0x557   :  { %v2548_v18 = vadd.f32 %v1113_v9, %v1112_v14 }
 0x559   :  { %1518 = vst [vmem:[%s2702_s6 + $0x20] sm:$0xff] %v2548_v18  ;;  %v1121_v43 = vpack.c.bf16 %v2548_v18, %v2548_v18 }
 0x55b   :  { %1155 = vmatmul.mubr.bf16.vlgmr.msra.gmra.mrb[36].mxu0 %v1121_v43  ;;  %1753 = vmatmul.mubr.bf16.vlgmr.msra.gmra.mrb[28].mxu1 %v1121_v43 }
 0x55c   :  { %1233 = vmatpush1.bf16.msra.mxu0 %v2088_v26  ;;  %1757 = vmatpush3.bf16.msra.mxu1 %v2131_v35  ;;  %v1947_v26 = vld [vmem:[%s2698_s3 + $0x4] ss:$12 sps:$4 sm:$0xff]  }
 0x55d   :  { %1234 = vmatprep.subr.bf16.mxu0 %v2094_v27  ;;  %1758 = vmatprep.subr.bf16.mxu1 %v2712_v17 }
 0x55e   :  { %1264 = vmatprep.mubr.bf16.mxu0 %v2713_v51  ;;  %1772 = vmatprep.mubr.msk.bf16.mxu1 %vm1971_vm0, %v2712_v17 }
 0x560   :  { %1235 = vmatpush1.bf16.msra.mxu0 %v2103_v29  ;;  %1759 = vmatpush3.bf16.msra.mxu1 %v2153_v39 }
 0x561   :  { %1236 = vmatprep.subr.bf16.mxu0 %v2110_v30  ;;  %1760 = vmatprep.subr.bf16.mxu1 %v2712_v17 }
 0x564   :  { %1237 = vmatpush1.bf16.msra.mxu0 %v2119_v32  ;;  %1761 = vmatpush3.bf16.msra.mxu1 %v2172_v42 }
 0x565   :  { %1238 = vmatprep.subr.bf16.mxu0 %v2125_v33  ;;  %1762 = vmatprep.subr.bf16.mxu1 %v2712_v17 }
 0x568   :  { %1239 = vmatpush1.bf16.msra.mxu0 %v2137_v36  ;;  %1763 = vmatpush3.bf16.msra.mxu1 %v2195_v46 }
 0x569   :  { %1240 = vmatprep.subr.bf16.mxu0 %v2147_v38  ;;  %1764 = vmatprep.subr.bf16.mxu1 %v2712_v17 }
 0x56c   :  { %1241 = vmatpush1.bf16.msra.mxu0 %v2160_v40  ;;  %1765 = vmatpush3.bf16.msra.mxu1 %v2216_v49 }
 0x56d   :  { %1242 = vmatprep.subr.bf16.mxu0 %v2166_v41  ;;  %1766 = vmatprep.subr.bf16.mxu1 %v2712_v17 }
 0x570   :  { %1243 = vmatpush1.bf16.msra.mxu0 %v2182_v44  ;;  %1767 = vmatpush3.bf16.msra.mxu1 %v2236_v52 }
 0x571   :  { %1244 = vmatprep.subr.bf16.mxu0 %v2189_v45  ;;  %1768 = vmatprep.subr.bf16.mxu1 %v2712_v17 }
 0x574   :  { %1245 = vmatpush1.bf16.msra.mxu0 %v2204_v47  ;;  %1769 = vmatpush3.bf16.msra.mxu1 %v2247_v54 }
 0x575   :  { %1246 = vmatprep.subr.bf16.mxu0 %v2210_v48  ;;  %1770 = vmatprep.subr.bf16.mxu1 %v2712_v17 }
 0x578   :  { %1247 = vmatpush1.bf16.msra.mxu0 %v2223_v50  ;;  %1771 = vmatpush3.bf16.msra.mxu1 %v2257_v55 }
 0x579   :  { %1342 = vmatprep.subr.bf16.mxu0 %v1947_v26  ;;  %1776 = vmatprep.subr.bf16.mxu1 %v2712_v17 }
 0x62e   :  { %v1156_v27 = vpop.f32.mrb[36].mxu0  ;;  %v1197_v29 = vpop.f32.mrb[28].mxu1 }
 0x62f   :  { %v1203_v30 = vadd.f32 %v1156_v27, %v2324_v53  ;;  %v1158_v32 = vpop.f32.mrb[37].mxu0  ;;  %v1754_v33 = vpop.f32.mrb[29].mxu1  ;;  %v1217_v48 = vadd.f32 %v2351_v61, %v1197_v29 }
 0x630   :  { %v1210_v35 = vadd.f32 %v1158_v32, %v2329_v59  ;;  %v1160_v36 = vpop.f32.mrb[38].mxu0  ;;  %v1200_v38 = vpop.f32.mrb[30].mxu1 }
 0x631   :  { %v1519_v39 = vmul.f32 -1.442695, %v1203_v30  ;;  %v1161_v40 = vpop.f32.mrb[39].mxu0  ;;  %v1755_v41 = vpop.f32.mrb[31].mxu1  ;;  %v2716_v38 = vld [vmem:[#allocation4_spill] sm:$0xff] }
 0x632   :  { %v1520_v42 = vmul.f32 -1.442695, %v1210_v35 }
 0x633   :  { %1917 = vpow2.f32 %v1519_v39 }
 0x634   :  { %1919 = vpow2.f32 %v1520_v42 }
 0x63d   :  { %v1918_v44 = vpop.eup %1917 }
 0x63e   :  { %v1207_v45 = vadd.f32 1.0, %v1918_v44  ;;  %v1920_v46 = vpop.eup %1919 }
 0x63f   :  { %v1214_v47 = vadd.f32 1.0, %v1920_v46 }
 0x640   :  { %1921 = vrcp.f32 %v1207_v45 }
 0x641   :  { %1923 = vrcp.f32 %v1214_v47 }
 0x64a   :  { %v1922_v49 = vpop.eup %1921 }
 0x64b   :  { %v1218_v50 = vmul.f32 %v1922_v49, %v1217_v48  ;;  %v1924_v53 = vpop.eup %1923 }
 0x64c   :  { %v1221_v59 = vsub.f32 1.0, %v1924_v53  ;;  %v1223_v7 = vmul.f32 %v1924_v53, %v2548_v18 }
 0x64d   :  { %v1219_v52 = vadd.f32 %v1218_v50, %v2338_v8  ;;  %v1948_v8 = vld [vmem:[%s2698_s3] ss:$12 sps:$4 sm:$0xff]  }
 0x64e   :  { %v2717_v50 = vld [vmem:[#allocation8_spill] sm:$0xff] }
 0x64f   :  { %1925 = vtanh.f32 %v1219_v52 }
 0x659   :  { %v1926_v60 = vpop.eup %1925 }
 0x65a   :  { %v1222_v11 = vmul.f32 %v1926_v60, %v1221_v59 }
 0x65c   :  { %v2598_v57 = vadd.f32 %v1223_v7, %v1222_v11 }
 0x65e   :  { %1521 = vst [vmem:[%s2702_s6 + $0x28] sm:$0xff] %v2598_v57  ;;  %v1231_v2 = vpack.c.bf16 %v2598_v57, %v2598_v57 }
 0x660   :  { %1265 = vmatmul.mubr.bf16.vlgmr.msra.gmra.mrb[40].mxu0 %v1231_v2  ;;  %1773 = vmatmul.mubr.bf16.vlgmr.msra.gmra.mrb[32].mxu1 %v1231_v2 }
 0x661   :  { %1343 = vmatpush1.bf16.msra.mxu0 %v1948_v8  ;;  %1777 = vmatpush3.bf16.msra.mxu1 %v1949_v5 }
 0x662   :  { %1344 = vmatprep.subr.bf16.mxu0 %v1950_v58  ;;  %1778 = vmatprep.subr.bf16.mxu1 %v2712_v17 }
 0x663   :  { %1374 = vmatprep.mubr.bf16.mxu0 %v2713_v51  ;;  %1792 = vmatprep.mubr.msk.bf16.mxu1 %vm1971_vm0, %v2712_v17  ;;  %v1954_v51 = vld [vmem:[%s2698_s3 + $0x30] ss:$12 sps:$4 sm:$0xff]  }
 0x665   :  { %1345 = vmatpush1.bf16.msra.mxu0 %v1951_v20  ;;  %1779 = vmatpush3.bf16.msra.mxu1 %v1952_v22 }
 0x666   :  { %1346 = vmatprep.subr.bf16.mxu0 %v1953_v56  ;;  %1780 = vmatprep.subr.bf16.mxu1 %v2712_v17 }
 0x669   :  { %1347 = vmatpush1.bf16.msra.mxu0 %v1954_v51  ;;  %1781 = vmatpush3.bf16.msra.mxu1 %v1955_v16 }
 0x66a   :  { %1348 = vmatprep.subr.bf16.mxu0 %v1956_v10  ;;  %1782 = vmatprep.subr.bf16.mxu1 %v2712_v17 }
 0x66d   :  { %1349 = vmatpush1.bf16.msra.mxu0 %v1957_v13  ;;  %1783 = vmatpush3.bf16.msra.mxu1 %v1958_v19  ;;  %v2718_v13 = vld [vmem:[#allocation5_spill] sm:$0xff] }
 0x66e   :  { %1350 = vmatprep.subr.bf16.mxu0 %v1959_v23  ;;  %1784 = vmatprep.subr.bf16.mxu1 %v2712_v17 }
 0x671   :  { %1351 = vmatpush1.bf16.msra.mxu0 %v1960_v62  ;;  %1785 = vmatpush3.bf16.msra.mxu1 %v1961_v63 }
 0x672   :  { %1352 = vmatprep.subr.bf16.mxu0 %v1962_v0  ;;  %1786 = vmatprep.subr.bf16.mxu1 %v2712_v17 }
 0x675   :  { %1353 = vmatpush1.bf16.msra.mxu0 %v1963_v1  ;;  %1787 = vmatpush3.bf16.msra.mxu1 %v1964_v34 }
 0x676   :  { %1354 = vmatprep.subr.bf16.mxu0 %v1965_v24  ;;  %1788 = vmatprep.subr.bf16.mxu1 %v2712_v17 }
 0x679   :  { %1355 = vmatpush1.bf16.msra.mxu0 %v1966_v4  ;;  %1789 = vmatpush3.bf16.msra.mxu1 %v2247_v54 }
 0x67a   :  { %1356 = vmatprep.subr.bf16.mxu0 %v1967_v15  ;;  %1790 = vmatprep.subr.bf16.mxu1 %v2712_v17 }
 0x67d   :  { %1357 = vmatpush1.bf16.msra.mxu0 %v1968_v37  ;;  %1791 = vmatpush3.bf16.msra.mxu1 %v2257_v55 }
 0x733   :  { %v1266_v25 = vpop.f32.mrb[40].mxu0  ;;  %v1307_v21 = vpop.f32.mrb[32].mxu1 }
 0x734   :  { %v1313_v3 = vadd.f32 %v1266_v25, %v2714_v31  ;;  %v1268_v12 = vpop.f32.mrb[41].mxu0  ;;  %v1774_v54 = vpop.f32.mrb[33].mxu1  ;;  %v1327_v33 = vadd.f32 %v2351_v61, %v1307_v21 }
 0x735   :  { %v1320_v14 = vadd.f32 %v1268_v12, %v2715_v6  ;;  %v1270_v9 = vpop.f32.mrb[42].mxu0  ;;  %v1310_v18 = vpop.f32.mrb[34].mxu1 }
 0x736   :  { %v1522_v43 = vmul.f32 -1.442695, %v1313_v3  ;;  %v1271_v26 = vpop.f32.mrb[43].mxu0  ;;  %v1775_v17 = vpop.f32.mrb[35].mxu1 }
 0x737   :  { %v1523_v27 = vmul.f32 -1.442695, %v1320_v14 }
 0x738   :  { %1927 = vpow2.f32 %v1522_v43 }
 0x739   :  { %1929 = vpow2.f32 %v1523_v27 }
 0x742   :  { %v1928_v29 = vpop.eup %1927 }
 0x743   :  { %v1317_v30 = vadd.f32 1.0, %v1928_v29  ;;  %v1930_v55 = vpop.eup %1929 }
 0x744   :  { %v1324_v32 = vadd.f32 1.0, %v1930_v55 }
 0x745   :  { %1931 = vrcp.f32 %v1317_v30 }
 0x746   :  { %1933 = vrcp.f32 %v1324_v32 }
 0x74f   :  { %v1932_v35 = vpop.eup %1931 }
 0x750   :  { %v1328_v36 = vmul.f32 %v1932_v35, %v1327_v33  ;;  %v1934_v40 = vpop.eup %1933 }
 0x751   :  { %v1331_v41 = vsub.f32 1.0, %v1934_v40  ;;  %v1333_v45 = vmul.f32 %v1934_v40, %v2598_v57 }
 0x752   :  { %v1329_v39 = vadd.f32 %v1328_v36, %v2716_v38 }
 0x754   :  { %1935 = vtanh.f32 %v1329_v39 }
 0x75e   :  { %v1936_v42 = vpop.eup %1935 }
 0x75f   :  { %v1332_v44 = vmul.f32 %v1936_v42, %v1331_v41 }
 0x761   :  { %v1334_v46 = vadd.f32 %v1333_v45, %v1332_v44 }
 0x763   :  { %1524 = vst [vmem:[%s2702_s6 + $0x30] sm:$0xff] %v1334_v46  ;;  %v1341_v47 = vpack.c.bf16 %v1334_v46, %v1334_v46 }
 0x765   :  { %1375 = vmatmul.mubr.bf16.vlgmr.msra.gmra.mrb[44].mxu0 %v1341_v47  ;;  %1793 = vmatmul.mubr.bf16.vlgmr.msra.gmra.mrb[36].mxu1 %v1341_v47 }
 0x838   :  { %v1376_v48 = vpop.f32.mrb[44].mxu0  ;;  %v1417_v49 = vpop.f32.mrb[36].mxu1 }
 0x839   :  { %v1423_v52 = vadd.f32 %v1376_v48, %v2717_v50  ;;  %v1378_v53 = vpop.f32.mrb[45].mxu0  ;;  %v1794_v59 = vpop.f32.mrb[37].mxu1  ;;  %v1437_v51 = vadd.f32 %v2351_v61, %v1417_v49 }
 0x83a   :  { %v1430_v60 = vadd.f32 %v1378_v53, %v2346_v28  ;;  %v1380_v11 = vpop.f32.mrb[46].mxu0  ;;  %v1420_v7 = vpop.f32.mrb[38].mxu1 }
 0x83b   :  { %v1525_v2 = vmul.f32 -1.442695, %v1423_v52  ;;  %v1381_v57 = vpop.f32.mrb[47].mxu0  ;;  %v1795_v8 = vpop.f32.mrb[39].mxu1 }
 0x83c   :  { %v1526_v5 = vmul.f32 -1.442695, %v1430_v60 }
 0x83d   :  { %1937 = vpow2.f32 %v1525_v2 }
 0x83e   :  { %1939 = vpow2.f32 %v1526_v5 }
 0x847   :  { %v1938_v58 = vpop.eup %1937 }
 0x848   :  { %v1427_v20 = vadd.f32 1.0, %v1938_v58  ;;  %v1940_v22 = vpop.eup %1939 }
 0x849   :  { %v1434_v56 = vadd.f32 1.0, %v1940_v22 }
 0x84a   :  { %1941 = vrcp.f32 %v1427_v20 }
 0x84b   :  { %1943 = vrcp.f32 %v1434_v56 }
 0x854   :  { %v1942_v16 = vpop.eup %1941 }
 0x855   :  { %v1438_v10 = vmul.f32 %v1942_v16, %v1437_v51  ;;  %v1944_v19 = vpop.eup %1943 }
 0x856   :  { %v1441_v23 = vsub.f32 1.0, %v1944_v19  ;;  %v1443_v0 = vmul.f32 %v1944_v19, %v1334_v46 }
 0x857   :  { %v1439_v28 = vadd.f32 %v1438_v10, %v2718_v13 }
 0x859   :  { %1945 = vtanh.f32 %v1439_v28 }
 0x863   :  { %v1946_v62 = vpop.eup %1945 }
 0x864   :  { %v1442_v63 = vmul.f32 %v1946_v62, %v1441_v23 }
 0x866   :  { %v1444_v1 = vadd.f32 %v1443_v0, %v1442_v63 }
 0x868   :  { %1527 = vst [vmem:[%s2702_s6 + $0x38] sm:$0xff] %v1444_v1 }

</bundles_post_ra>
